<compile_context>
chip_gen: v6e
topology: v6e:2x2x1
jax: 0.10.0
libtpu: 0.0.40
codegen_flags: <defaults>
</compile_context>

<pallas_src>
import functools

import numpy as np
import jax
import jax.numpy as jnp
from jax import lax
from jax.experimental import pallas as pl
from jax.experimental.pallas import tpu as pltpu


# --------------------------------------------------------------------------------------
# Host-side parameter construction (same seeds as the PyTorch __init__).
# --------------------------------------------------------------------------------------
def _torch_seeded_rand(input_dim1, input_dim2, output_dim):
    np.random.seed(1)
    rand_h_1 = np.random.randint(output_dim, size=input_dim1)
    np.random.seed(3)
    rand_s_1 = 2 * np.random.randint(2, size=input_dim1) - 1
    np.random.seed(5)
    rand_h_2 = np.random.randint(output_dim, size=input_dim2)
    np.random.seed(7)
    rand_s_2 = 2 * np.random.randint(2, size=input_dim2) - 1
    return rand_h_1, rand_s_1, rand_h_2, rand_s_2


def _dense_sketch(rand_h, rand_s, output_dim):
    """Dense [input_dim, output_dim] count-sketch matrix (numpy reference only)."""
    rand_h = np.asarray(rand_h).astype(np.int64)
    rand_s = np.asarray(rand_s).astype(np.float32)
    m = np.zeros((len(rand_h), output_dim), dtype=np.float32)
    m[np.arange(len(rand_h)), rand_h] = rand_s
    return m


def make_cbp_params(input_dim1, input_dim2, output_dim,
                    rand_h_1=None, rand_s_1=None, rand_h_2=None, rand_s_2=None):
    """Returns (w1re, w1im, w2re, w2im, idft_cos, idft_sin), all float32.

    w?re/w?im : (input_dim, Oh_pad)  count-sketch fused with the forward half-spectrum DFT
                (FFT of sketch row d is rand_s[d]*exp(-2*pi*i*rand_h[d]*k/O)).
    idft_*    : (Oh_pad, output_dim) weighted inverse half-DFT (DC/Nyquist weight 1,
                interior bins 2), applied OUTSIDE the kernel to the summed spectrum.
    Oh_pad = round_up(output_dim//2 + 1, 128)  (zero-padded, lane-aligned frequency bins).
    """
    if rand_h_1 is None or rand_s_1 is None or rand_h_2 is None or rand_s_2 is None:
        rand_h_1, rand_s_1, rand_h_2, rand_s_2 = _torch_seeded_rand(
            input_dim1, input_dim2, output_dim)

    O = int(output_dim)
    Oh = O // 2 + 1
    Oh_pad = ((Oh + 127) // 128) * 128
    k = np.arange(Oh, dtype=np.float64)[None, :]

    def fused(rand_h, rand_s):
        h = np.asarray(rand_h, dtype=np.float64)[:, None]
        s = np.asarray(rand_s, dtype=np.float64)[:, None]
        ang = 2.0 * np.pi * h * k / O
        re = np.zeros((h.shape[0], Oh_pad), np.float32)
        im = np.zeros((h.shape[0], Oh_pad), np.float32)
        re[:, :Oh] = (s * np.cos(ang)).astype(np.float32)     # Re FFT(sketch row)
        im[:, :Oh] = (-s * np.sin(ang)).astype(np.float32)    # Im FFT(sketch row)
        return re, im

    w1re, w1im = fused(rand_h_1, rand_s_1)
    w2re, w2im = fused(rand_h_2, rand_s_2)

    n = np.arange(O, dtype=np.float64)[None, :]
    kk = np.arange(Oh, dtype=np.float64)[:, None]
    wgt = np.full((Oh, 1), 2.0)
    wgt[0, 0] = 1.0
    if O % 2 == 0:
        wgt[O // 2, 0] = 1.0
    ang = 2.0 * np.pi * kk * n / O
    idft_c = np.zeros((Oh_pad, O), np.float32)
    idft_s = np.zeros((Oh_pad, O), np.float32)
    idft_c[:Oh] = (wgt * np.cos(ang)).astype(np.float32)
    idft_s[:Oh] = (wgt * np.sin(ang)).astype(np.float32)

    return tuple(jnp.asarray(a) for a in (w1re, w1im, w2re, w2im, idft_c, idft_s))


# --------------------------------------------------------------------------------------
# Tile planning
# --------------------------------------------------------------------------------------
def _device_kind():
    try:
        return jax.devices()[0].device_kind.lower()
    except Exception:
        return ""


def _legal_tb(B, HW, tb):
    if tb < 1 or B % tb:
        return False
    return tb == B or (tb % 8 == 0 and (tb * HW) % 8 == 0)


def _toh_candidates(Oh_pad):
    # Descending multiples of 128 that divide Oh_pad (always contains Oh_pad and 128).
    return [t for t in range(Oh_pad, 0, -128) if Oh_pad % t == 0]


def _step_vmem_bytes(TB, TOh, HW, D1, D2, itemsize, weights_resident):
    TM = TB * HW
    wbuf = 1 if weights_resident else 2
    x = 2 * TM * (D1 + D2) * itemsize           # double-buffered activation blocks
    w = wbuf * 2 * TOh * (D1 + D2) * itemsize   # [re||im] weight blocks
    o = 2 * TB * 2 * TOh * 4                    # double-buffered f32 output block
    tmp = 6 * TM * TOh * 4                      # f1,f2 (4 TOh tiles) + pr/pi + slack, f32
    return x + w + o + tmp


def _choose_tb(B, HW, row_target):
    """Smallest tile-legal batch tile with TB*HW >= row_target MXU rows."""
    tb_min = max(1, -(-row_target // HW))       # ceil(row_target / HW)
    for tb in range(min(tb_min, B), B + 1):     # search UPWARD; TB=B only if B is small
        if _legal_tb(B, HW, tb):
            return tb
    return B


def _plan_tiles(B, HW, Oh_pad, D1, D2, itemsize, row_target, budget, want_two_steps):
    tb = _choose_tb(B, HW, row_target)
    cands = _toh_candidates(Oh_pad)

    def fits(t, o):
        return _step_vmem_bytes(t, o, HW, D1, D2, itemsize, o == Oh_pad) <= budget

    toh = next((o for o in cands if fits(tb, o)), None)
    if toh is None:
        # Even TOh=128 busts the budget at this TB: shrink the batch tile as well.
        for t in sorted(t for t in range(1, B + 1) if _legal_tb(B, HW, t)):
            toh = next((o for o in cands if fits(t, o)), None)
            if toh is not None:
                tb = t
                break
    if toh is None:
        tb, toh = _choose_tb(B, HW, 1), cands[-1]    # best effort
    # v7x has 2 TensorCores: guarantee >= 2 steps along a "parallel" grid axis.
    if want_two_steps and (B // tb) * (Oh_pad // toh) < 2:
        smaller = [o for o in cands if o < toh]
        if smaller:
            toh = smaller[0]
    return tb, toh


# --------------------------------------------------------------------------------------
# Pallas kernel
# --------------------------------------------------------------------------------------
def _cbp_kernel(x1_ref, x2_ref, w1_ref, w2_ref, out_ref, *, tb, hw, toh, precision):
    # Two fat MXU matmuls: count-sketch fused with the half-spectrum forward DFT,
    # real|imag halves concatenated along lanes -> (TM, 2*TOh) each, f32 accumulation.
    f1 = jnp.dot(x1_ref[...], w1_ref[...],
                 preferred_element_type=jnp.float32, precision=precision)
    f2 = jnp.dot(x2_ref[...], w2_ref[...],
                 preferred_element_type=jnp.float32, precision=precision)
    f1r, f1i = f1[:, :toh], f1[:, toh:]
    f2r, f2i = f2[:, :toh], f2[:, toh:]

    # Complex elementwise product (VPU); per-batch spatial sum via reshape + sublane
    # reduction (XLU/VPU -- MXU stays free).  pr is stored before pi is built to cap the
    # number of live (TM, TOh) f32 temporaries.
    pr = f1r * f2r - f1i * f2i
    out_ref[:, :toh] = pr.reshape(tb, hw, toh).sum(axis=1)
    pi = f1r * f2i + f1i * f2r
    out_ref[:, toh:] = pi.reshape(tb, hw, toh).sum(axis=1)


def compact_bilinear_pooling(bottom1, bottom2, params, *,
                             compute_dtype=jnp.bfloat16,
                             block_batch=None, block_out=None,
                             inputs_channels_last=False):
    """bottom1: (B, D1, H, W), bottom2: (B, D2, H, W)  ->  (B, output_dim)  (sum_pool=True).

    With inputs_channels_last=True the inputs are (B, H, W, C) and the NCHW->NHWC
    transpose (a full HBM round trip, noticeable on v5e) is skipped.
    """
    w1re, w1im, w2re, w2im, idft_c, idft_s = params
    if inputs_channels_last:
        B, H, W, D1 = bottom1.shape
        D2 = bottom2.shape[3]
    else:
        B, D1, H, W = bottom1.shape
        D2 = bottom2.shape[1]
    HW = H * W
    Oh_pad = w1re.shape[1]
    O = idft_c.shape[1]

    kind = _device_kind()
    is_v7x = "v7" in kind
    is_v5 = "v5" in kind
    vmem_limit = (56 if is_v7x else 100) * 1024 * 1024   # 64 MiB physical on v7x
    tile_budget = int(0.8 * vmem_limit)                  # headroom for compiler temps
    row_target = 256 if is_v5 else 512                   # 128x128 MXU vs 256x256 MXU
    itemsize = jnp.dtype(compute_dtype).itemsize

    TB, TOh = _plan_tiles(B, HW, Oh_pad, D1, D2, itemsize, row_target, tile_budget,
                          want_two_steps=is_v7x)
    if block_batch is not None:
        TB = block_batch
    if block_out is not None:
        TOh = block_out
    assert B % TB == 0 and (TB == B or TB % 8 == 0), (B, TB)
    assert Oh_pad % TOh == 0 and TOh % 128 == 0, (Oh_pad, TOh)
    TM = TB * HW
    n_i, n_j = B // TB, Oh_pad // TOh
    weights_resident = (n_j == 1)

    # NCHW -> (B*HW, C): enables one fat (TM, D)@(D, 2*TOh) MXU matmul per grid step.
    if inputs_channels_last:
        x1 = bottom1.reshape(B * HW, D1).astype(compute_dtype)
        x2 = bottom2.reshape(B * HW, D2).astype(compute_dtype)
    else:
        x1 = jnp.transpose(bottom1, (0, 2, 3, 1)).reshape(B * HW, D1).astype(compute_dtype)
        x2 = jnp.transpose(bottom2, (0, 2, 3, 1)).reshape(B * HW, D2).astype(compute_dtype)

    # Per-frequency-tile [re || im] concatenation of the fused sketch-DFT weights so the
    # kernel issues 2 dots per step instead of 4.
    def cat_w(re, im):
        D = re.shape[0]
        return jnp.concatenate(
            [re.reshape(D, n_j, TOh), im.reshape(D, n_j, TOh)], axis=2
        ).reshape(D, 2 * Oh_pad).astype(compute_dtype)

    w1c = cat_w(w1re, w1im)
    w2c = cat_w(w2re, w2im)

    precision = (lax.Precision.HIGHEST
                 if jnp.dtype(compute_dtype) == jnp.dtype(jnp.float32) else None)
    kernel = functools.partial(_cbp_kernel, tb=TB, hw=HW, toh=TOh, precision=precision)

    def w_spec(D):
        # Weight block index is constant along the inner (batch) grid axis; when it is
        # constant along the whole grid (n_j==1) a single buffer suffices.
        if weights_resident and hasattr(pl, "Buffered"):
            try:
                return pl.BlockSpec((D, 2 * TOh), lambda j, i: (0, j),
                                    pipeline_mode=pl.Buffered(1))
            except TypeError:
                pass
        return pl.BlockSpec((D, 2 * TOh), lambda j, i: (0, j))

    spec = pl.pallas_call(
        kernel,
        out_shape=jax.ShapeDtypeStruct((B, 2 * Oh_pad), jnp.float32),
        grid=(n_j, n_i),   # frequency tiles OUTER: weights DMA'd once per frequency tile
        in_specs=[
            pl.BlockSpec((TM, D1), lambda j, i: (i, 0)),
            pl.BlockSpec((TM, D2), lambda j, i: (i, 0)),
            w_spec(D1),
            w_spec(D2),
        ],
        out_specs=pl.BlockSpec((TB, 2 * TOh), lambda j, i: (i, j)),
        compiler_params=pltpu.CompilerParams(
            dimension_semantics=("parallel", "parallel"),
            vmem_limit_bytes=vmem_limit),
    )(x1, x2, w1c, w2c)

    # Epilogue: weighted inverse half-DFT of the spatially-summed spectrum as ONE plain
    # XLA matmul against the stacked [idft_cos; -idft_sin] matrix (laid out to match the
    # kernel's per-tile [pr || pi] column order).  The (Oh, O) cos/sin tables never enter
    # kernel VMEM.
    idft_cat = jnp.concatenate(
        [idft_c.reshape(n_j, TOh, O), (-idft_s).reshape(n_j, TOh, O)], axis=1
    ).reshape(2 * Oh_pad, O)
    return jnp.dot(spec, idft_cat, precision=lax.Precision.HIGHEST)   # (B, O) float32


# --------------------------------------------------------------------------------------
# Demo / correctness check
# --------------------------------------------------------------------------------------
if __name__ == "__main__":
    B, D1, D2, H, W, OUT = 2, 4, 8, 8, 8, 16

    key = jax.random.PRNGKey(0)
    k1, k2 = jax.random.split(key)
    bottom1 = jax.random.normal(k1, (B, D1, H, W), dtype=jnp.float32)
    bottom2 = jax.random.normal(k2, (B, D2, H, W), dtype=jnp.float32)

    params = make_cbp_params(D1, D2, OUT)

    # High-precision (f32 MXU-feeding) path: tight check vs. the PyTorch-equivalent math.
    out_f32 = jax.block_until_ready(
        compact_bilinear_pooling(bottom1, bottom2, params, compute_dtype=jnp.float32))

    rh1, rs1, rh2, rs2 = _torch_seeded_rand(D1, D2, OUT)
    skm1 = _dense_sketch(rh1, rs1, OUT)
    skm2 = _dense_sketch(rh2, rs2, OUT)
    b1 = np.asarray(bottom1).transpose(0, 2, 3, 1).reshape(-1, D1)
    b2 = np.asarray(bottom2).transpose(0, 2, 3, 1).reshape(-1, D2)
    prod = np.fft.fft(b1 @ skm1, axis=-1) * np.fft.fft(b2 @ skm2, axis=-1)
    ref = (np.fft.ifft(prod, axis=-1).real * OUT).reshape(B, H * W, OUT).sum(axis=1)

    np.testing.assert_allclose(np.asarray(out_f32), ref, rtol=2e-3, atol=2e-2)

    # Default bf16 MXU-feeding path (f32 accumulation): norm-wise check.
    out_bf16 = jax.block_until_ready(
        compact_bilinear_pooling(bottom1, bottom2, params))
    rel = np.linalg.norm(np.asarray(out_bf16, dtype=np.float64) - ref) / np.linalg.norm(ref)
    assert rel < 8e-2, f"bf16 path relative error too high: {rel}"

    print("KERNEL_OK")
</pallas_src>

<mosaic_0001>
module attributes {stable_mosaic.version = 11 : i64} {
  func.func @_cbp_kernel(%arg0: i32, %arg1: i32, %arg2: memref<128x4xf32, #tpu.memory_space<vmem>>, %arg3: memref<128x8xf32, #tpu.memory_space<vmem>>, %arg4: memref<4x256xf32, #tpu.memory_space<vmem>>, %arg5: memref<8x256xf32, #tpu.memory_space<vmem>>, %arg6: memref<2x256xf32, #tpu.memory_space<vmem>>) attributes {dimension_semantics = [#tpu.dimension_semantics<parallel>, #tpu.dimension_semantics<parallel>], iteration_bounds = array<i64: 1, 1>, scalar_prefetch = 0 : i64, scratch_operands = 0 : i64, tpu.core_type = #tpu.core_type<tc>, window_params = [{transform_indices = @transform_0, window_bounds = array<i64: 128, 4>}, {transform_indices = @transform_1, window_bounds = array<i64: 128, 8>}, {pipeline_mode = #tpu.pipeline_mode<synchronous>, transform_indices = @transform_2, window_bounds = array<i64: 4, 256>}, {pipeline_mode = #tpu.pipeline_mode<synchronous>, transform_indices = @transform_3, window_bounds = array<i64: 8, 256>}, {transform_indices = @transform_4, window_bounds = array<i64: 2, 256>}]} {
    %c0 = arith.constant 0 : index
    %c0_0 = arith.constant 0 : index
    %0 = vector.load %arg2[%c0, %c0_0] : memref<128x4xf32, #tpu.memory_space<vmem>>, vector<128x4xf32>
    %c0_1 = arith.constant 0 : index
    %c0_2 = arith.constant 0 : index
    %1 = vector.load %arg4[%c0_1, %c0_2] : memref<4x256xf32, #tpu.memory_space<vmem>>, vector<4x256xf32>
    %cst = arith.constant dense<0.000000e+00> : vector<128x256xf32>
    %2 = tpu.matmul %0, %1, %cst {dimension_numbers = #tpu.dot_dimension_numbers<[1], [0], [0], [1], [0, 0, 1, 1], [], []>, precision = #tpu.contract_precision<fp32>} : vector<128x4xf32>, vector<4x256xf32>, vector<128x256xf32> -> vector<128x256xf32>
    %c0_3 = arith.constant 0 : index
    %c0_4 = arith.constant 0 : index
    %3 = vector.load %arg3[%c0_3, %c0_4] : memref<128x8xf32, #tpu.memory_space<vmem>>, vector<128x8xf32>
    %c0_5 = arith.constant 0 : index
    %c0_6 = arith.constant 0 : index
    %4 = vector.load %arg5[%c0_5, %c0_6] : memref<8x256xf32, #tpu.memory_space<vmem>>, vector<8x256xf32>
    %cst_7 = arith.constant dense<0.000000e+00> : vector<128x256xf32>
    %5 = tpu.matmul %3, %4, %cst_7 {dimension_numbers = #tpu.dot_dimension_numbers<[1], [0], [0], [1], [0, 0, 1, 1], [], []>, precision = #tpu.contract_precision<fp32>} : vector<128x8xf32>, vector<8x256xf32>, vector<128x256xf32> -> vector<128x256xf32>
    %6 = vector.extract_strided_slice %2 {offsets = [0, 0], sizes = [128, 128], strides = [1, 1]} : vector<128x256xf32> to vector<128x128xf32>
    %7 = vector.extract_strided_slice %2 {offsets = [0, 128], sizes = [128, 128], strides = [1, 1]} : vector<128x256xf32> to vector<128x128xf32>
    %8 = vector.extract_strided_slice %5 {offsets = [0, 0], sizes = [128, 128], strides = [1, 1]} : vector<128x256xf32> to vector<128x128xf32>
    %9 = vector.extract_strided_slice %5 {offsets = [0, 128], sizes = [128, 128], strides = [1, 1]} : vector<128x256xf32> to vector<128x128xf32>
    %10 = arith.mulf %6, %8 : vector<128x128xf32>
    %11 = arith.mulf %7, %9 : vector<128x128xf32>
    %12 = arith.subf %10, %11 : vector<128x128xf32>
    %13 = vector.shape_cast %12 : vector<128x128xf32> to vector<2x64x128xf32>
    %cst_8 = arith.constant dense<0.000000e+00> : vector<2x128xf32>
    %14 = vector.multi_reduction <add>, %13, %cst_8 [1] : vector<2x64x128xf32> to vector<2x128xf32>
    %c0_9 = arith.constant 0 : index
    %c0_10 = arith.constant 0 : index
    %15 = vector.load %arg6[%c0_9, %c0_10] : memref<2x256xf32, #tpu.memory_space<vmem>>, vector<2x128xf32>
    tpu.vector_store %arg6[%c0_9, %c0_10], %14 {strides = array<i32>} : memref<2x256xf32, #tpu.memory_space<vmem>>, vector<2x128xf32>,
    %16 = arith.mulf %6, %9 : vector<128x128xf32>
    %17 = arith.mulf %7, %8 : vector<128x128xf32>
    %18 = arith.addf %16, %17 : vector<128x128xf32>
    %19 = vector.shape_cast %18 : vector<128x128xf32> to vector<2x64x128xf32>
    %cst_11 = arith.constant dense<0.000000e+00> : vector<2x128xf32>
    %20 = vector.multi_reduction <add>, %19, %cst_11 [1] : vector<2x64x128xf32> to vector<2x128xf32>
    %c0_12 = arith.constant 0 : index
    %c128 = arith.constant 128 : index
    %21 = vector.load %arg6[%c0_12, %c128] : memref<2x256xf32, #tpu.memory_space<vmem>>, vector<2x128xf32>
    tpu.vector_store %arg6[%c0_12, %c128], %20 {strides = array<i32>} : memref<2x256xf32, #tpu.memory_space<vmem>>, vector<2x128xf32>,
    return
  }
  func.func @transform_0(%arg0: i32, %arg1: i32) -> (i32, i32) {
    %c0_i32 = arith.constant 0 : i32
    %c0_i32_0 = arith.constant 0 : i32
    return %arg1, %c0_i32 : i32, i32
  }
  func.func @transform_1(%arg0: i32, %arg1: i32) -> (i32, i32) {
    %c0_i32 = arith.constant 0 : i32
    %c0_i32_0 = arith.constant 0 : i32
    return %arg1, %c0_i32 : i32, i32
  }
  func.func @transform_2(%arg0: i32, %arg1: i32) -> (i32, i32) {
    %c0_i32 = arith.constant 0 : i32
    %c0_i32_0 = arith.constant 0 : i32
    return %c0_i32, %arg0 : i32, i32
  }
  func.func @transform_3(%arg0: i32, %arg1: i32) -> (i32, i32) {
    %c0_i32 = arith.constant 0 : i32
    %c0_i32_0 = arith.constant 0 : i32
    return %c0_i32, %arg0 : i32, i32
  }
  func.func @transform_4(%arg0: i32, %arg1: i32) -> (i32, i32) {
    %c0_i32 = arith.constant 0 : i32
    return %arg1, %arg0 : i32, i32
  }
}

</mosaic_0001>

<bundles_post_ra>
// kernel: tpu_custom_call.1
= control target key start
LH: loop header
LB: loop body
LE: loop exit
PB: predicated region body
PF: predicated region fallthrough
CT: control target
= control target key end

     0   :  { %vm86_vm0 = vcmask 1043456   ;;  %vm37_vm1 = vcmask 31744   ;;  %v4238_v5 = vmov 0.0   ;;  %s4218_s0 = inlined_call_operand.vmem [shape: f32[128,4], index: 0, kind: input, shape index: {}]   ;;  %s4219_s1 = inlined_call_operand.vmem [shape: f32[128,8], index: 1, kind: input, shape index: {}]   ;;  %s4220_s2 = inlined_call_operand.vmem [shape: f32[4,256], index: 2, kind: input, shape index: {}]   ;;  %s4221_s3 = inlined_call_operand.vmem [shape: f32[8,256], index: 3, kind: input, shape index: {}]   ;;  %s4222_s4 = inlined_call_operand.hbm [shape: f32[2,256], index: 4, kind: output, shape index: {}]  }
   0x1   :  { %v34_v0 = vld [vmem:[%s4220_s2] sm:$0xff]  ;;  %v19_v2 = vld [vmem:[%s4218_s0 + $0x8] sm:$0xff]  ;;  %157 = vmatprep.mubr.f32.mxu0 %v4238_v5  ;;  %408 = vmatprep.mubr.f32.mxu1 %v4238_v5  ;;  %v20_v8 = vld [vmem:[%s4218_s0 + $0x10] sm:$0xff] }
   0x2   :  { %v18_v1 = vld [vmem:[%s4218_s0] sm:$0xff]  ;;  %v36_v3 = vcombine.high %v34_v0, %v34_v0  ;;  %v87_v4 = vsel %vm86_vm0, %v34_v0, 0  ;;  %v42_v7 = vsel %vm37_vm1, %v19_v2, 0  ;;  %v21_v9 = vld [vmem:[%s4218_s0 + $0x18] sm:$0xff]  ;;  %v45_v14 = vsel %vm37_vm1, %v20_v8, 0  ;;  %v23_v23 = vld [vmem:[%s4218_s0 + $0x28] sm:$0xff] }
   0x3   :  { %v39_v6 = vsel %vm37_vm1, %v18_v1, 0  ;;  %v22_v10 = vld [vmem:[%s4218_s0 + $0x20] sm:$0xff]  ;;  %v2853_v11 = vand.u32 4294901760, %v87_v4  ;;  %v2857_v13 = vand.u32 4294901760, %v42_v7  ;;  %v2861_v16 = vand.u32 4294901760, %v45_v14 }
   0x4   :  { %v2855_v12 = vand.u32 4294901760, %v39_v6  ;;  %v89_v15 = vsel %vm86_vm0, %v36_v3, 0  ;;  %v48_v17 = vsel %vm37_vm1, %v21_v9, 0  ;;  %v51_v18 = vsel %vm37_vm1, %v22_v10, 0 }
   0x5   :  { %v121_v19 = vand.u32 4294901760, %v89_v15  ;;  %v2869_v21 = vsub.f32 %v87_v4, %v2853_v11  ;;  %v2872_v22 = vsub.f32 %v42_v7, %v2857_v13  ;;  %v2878_v24 = vsub.f32 %v45_v14, %v2861_v16 }
   0x6   :  { %v2866_v20 = vsub.f32 %v39_v6, %v2855_v12  ;;  %v2880_v25 = vand.u32 4294901760, %v48_v17 }
   0x7   :  { %122 = vmatprep.subr.mxu0 %v121_v19  ;;  %v365_v27 = vsub.f32 %v89_v15, %v121_v19  ;;  %v372_v28 = vand.u32 4294901760, %v2869_v21  ;;  %v171_v29 = vand.u32 4294901760, %v2872_v22 }
   0x8   :  { %v160_v26 = vand.u32 4294901760, %v2866_v20 }
   0x9   :  { %9 = vsyncpa [#allocation3], 0  ;;  %124 = vmatpush1.msra.mxu0 %v2853_v11  ;;  %v182_v30 = vand.u32 4294901760, %v2878_v24  ;;  %v2888_v31 = vsub.f32 %v48_v17, %v2880_v25  ;;  %v2890_v32 = vand.u32 4294901760, %v51_v18  ;;  %v54_v33 = vsel %vm37_vm1, %v23_v23, 0  ;;  %v24_v40 = vld [vmem:[%s4218_s0 + $0x30] sm:$0xff] }
   0xa   :  { %v161_v34 = vsub.f32 %v2866_v20, %v160_v26  ;;  %v366_v35 = vand.u32 4294901760, %v365_v27  ;;  %553 = vmatprep.subr.mxu0 %v365_v27  ;;  %v373_v36 = vsub.f32 %v2869_v21, %v372_v28  ;;  %v172_v37 = vsub.f32 %v2872_v22, %v171_v29  ;;  %v25_v49 = vld [vmem:[%s4218_s0 + $0x38] sm:$0xff]  ;;  %v26_v56 = vld [vmem:[%s4218_s0 + $0x40] sm:$0xff]  ;;  %v27_v63 = vld [vmem:[%s4218_s0 + $0x48] sm:$0xff] }
   0xb   :  { %v2906_v42 = vsub.f32 %v51_v18, %v2890_v32  ;;  %v2908_v43 = vand.u32 4294901760, %v54_v33  ;;  %v183_v46 = vsub.f32 %v2878_v24, %v182_v30  ;;  %v193_v47 = vand.u32 4294901760, %v2888_v31  ;;  %v28_v6 = vld [vmem:[%s4218_s0 + $0x50] sm:$0xff]  ;;  %v29_v18 = vld [vmem:[%s4218_s0 + $0x58] sm:$0xff] }
   0xc   :  { %v162_v38 = vand.u32 4294901760, %v161_v34  ;;  %v367_v39 = vsub.f32 %v365_v27, %v366_v35  ;;  %v374_v41 = vand.u32 4294901760, %v373_v36  ;;  %v173_v45 = vand.u32 4294901760, %v172_v37 }
   0xd   :  { %v57_v48 = vsel %vm37_vm1, %v24_v40, 0  ;;  %v2921_v50 = vsub.f32 %v54_v33, %v2908_v43  ;;  %v184_v51 = vand.u32 4294901760, %v183_v46  ;;  %v194_v52 = vsub.f32 %v2888_v31, %v193_v47 }
   0xe   :  { %163 = vmatmul.mubr.f32.vlgmr.msra.gmra.mxu0 %v162_v38  ;;  %v368_v44 = vand.u32 4294901760, %v367_v39  ;;  %v204_v53 = vand.u32 4294901760, %v2906_v42  ;;  %v2928_v54 = vand.u32 4294901760, %v57_v48  ;;  %v60_v55 = vsel %vm37_vm1, %v25_v49, 0 }
   0xf   :  { %168 = vmatprep.mubr.f32.mxu0 %v4238_v5  ;;  %556 = vmatpush1.msra.mxu0 %v2869_v21  ;;  %v215_v57 = vand.u32 4294901760, %v2921_v50  ;;  %v195_v58 = vand.u32 4294901760, %v194_v52  ;;  %v2945_v61 = vand.u32 4294901760, %v60_v55  ;;  %v63_v62 = vsel %vm37_vm1, %v26_v56, 0  ;;  %v32_v56 = vld [vmem:[%s4218_s0 + $0x70] sm:$0xff] }
  0x10   :  { %369 = vmatprep.subr.mxu1 %v368_v44  ;;  %962 = vmatprep.subr.mxu0 %v366_v35  ;;  %v205_v59 = vsub.f32 %v2906_v42, %v204_v53  ;;  %v2943_v60 = vsub.f32 %v57_v48, %v2928_v54  ;;  %v2961_v4 = vand.u32 4294901760, %v63_v62  ;;  %v66_v7 = vsel %vm37_vm1, %v27_v63, 0  ;;  %v30_v35 = vld [vmem:[%s4218_s0 + $0x60] sm:$0xff] }
  0x11   :  { %375 = vmatpush1.msra.mxu1 %v374_v41  ;;  %v216_v0 = vsub.f32 %v2921_v50, %v215_v57  ;;  %v2959_v3 = vsub.f32 %v60_v55, %v2945_v61  ;;  %v69_v9 = vsel %vm37_vm1, %v28_v6, 0  ;;  %v2978_v17 = vand.u32 4294901760, %v66_v7  ;;  %v33_v6 = vld [vmem:[%s4218_s0 + $0x78] sm:$0xff] }
  0x12   :  { %174 = vmatmul.mubr.f32.gmra.mxu0 %v173_v45  ;;  %410 = vmatmul.mubr.f32.vlgmr.msra.gmra.mxu1 %v2855_v12  ;;  %v206_v1 = vand.u32 4294901760, %v205_v59  ;;  %v226_v2 = vand.u32 4294901760, %v2943_v60  ;;  %v2976_v15 = vsub.f32 %v63_v62, %v2961_v4  ;;  %v72_v36 = vsel %vm37_vm1, %v29_v18, 0  ;;  %v31_v45 = vld [vmem:[%s4218_s0 + $0x68] sm:$0xff] }
  0x13   :  { %749 = vmatprep.subr.mxu1 %v121_v19  ;;  %179 = vmatprep.mubr.f32.mxu0 %v4238_v5  ;;  %v217_v8 = vand.u32 4294901760, %v216_v0  ;;  %v237_v14 = vand.u32 4294901760, %v2959_v3  ;;  %v2993_v34 = vsub.f32 %v66_v7, %v2978_v17  ;;  %v75_v38 = vsel %vm37_vm1, %v30_v35, 0 }
  0x14   :  { %751 = vmatpush1.msra.mxu1 %v2853_v11  ;;  %415 = vmatprep.mubr.f32.mxu1 %v4238_v5  ;;  %v227_v10 = vsub.f32 %v2943_v60, %v226_v2  ;;  %v248_v33 = vand.u32 4294901760, %v2976_v15  ;;  %v3010_v44 = vand.u32 4294901760, %v72_v36  ;;  %v3017_v46 = vand.u32 4294901760, %v75_v38 }
  0x15   :  { %1143 = vmatprep.subr.mxu1 %v121_v19  ;;  %v2985_v19 = vand.u32 4294901760, %v69_v9  ;;  %v238_v27 = vsub.f32 %v2959_v3, %v237_v14  ;;  %v259_v41 = vand.u32 4294901760, %v2993_v34  ;;  %v78_v55 = vsel %vm37_vm1, %v31_v45, 0 }
  0x16   :  { %185 = vmatmul.mubr.f32.gmra.mxu0 %v184_v51  ;;  %417 = vmatmul.mubr.f32.gmra.mxu1 %v2857_v13  ;;  %v228_v23 = vand.u32 4294901760, %v227_v10  ;;  %v249_v40 = vsub.f32 %v2976_v15, %v248_v33  ;;  %v3025_v52 = vsub.f32 %v72_v36, %v3010_v44  ;;  %v3041_v0 = vand.u32 4294901760, %v78_v55 }
  0x17   :  { %190 = vmatprep.mubr.f32.mxu0 %v4238_v5  ;;  %422 = vmatprep.mubr.f32.mxu1 %v4238_v5  ;;  %v3002_v37 = vsub.f32 %v69_v9, %v2985_v19  ;;  %v239_v39 = vand.u32 4294901760, %v238_v27  ;;  %v260_v49 = vsub.f32 %v2993_v34, %v259_v41  ;;  %vm1309_vm2 = vcmask 64512  }
  0x18   :  { %v250_v48 = vand.u32 4294901760, %v249_v40  ;;  %v281_v63 = vand.u32 4294901760, %v3025_v52  ;;  %v3055_v10 = vsub.f32 %v78_v55, %v3041_v0  ;;  %v1308_v55 = vld [vmem:[%s4221_s3 + $0x8] sm:$0xff]  ;;  %vm2653_vm3 = vcmask 1041409  }
  0x19   :  { %v270_v51 = vand.u32 4294901760, %v3002_v37  ;;  %v261_v59 = vand.u32 4294901760, %v260_v49  ;;  %vm2655_vm4 = vcmask 1043459   ;;  %vm2657_vm5 = vcmask 1045509  }
  0x1a   :  { %196 = vmatmul.mubr.f32.gmra.mxu0 %v195_v58  ;;  %424 = vmatmul.mubr.f32.gmra.mxu1 %v2861_v16  ;;  %v3034_v58 = vsub.f32 %v75_v38, %v3017_v46  ;;  %v282_v9 = vsub.f32 %v3025_v52, %v281_v63  ;;  %v303_v36 = vand.u32 4294901760, %v3055_v10  ;;  %vm2659_vm6 = vcmask 1047559  }
  0x1b   :  { %201 = vmatprep.mubr.f32.mxu0 %v4238_v5  ;;  %429 = vmatprep.mubr.f32.mxu1 %v4238_v5  ;;  %v271_v62 = vsub.f32 %v3002_v37, %v270_v51 }
  0x1c   :  { %v292_v7 = vand.u32 4294901760, %v3034_v58  ;;  %v283_v35 = vand.u32 4294901760, %v282_v9  ;;  %v304_v45 = vsub.f32 %v3055_v10, %v303_v36 }
  0x1e   :  { %207 = vmatmul.mubr.f32.gmra.mxu0 %v206_v1  ;;  %431 = vmatmul.mubr.f32.gmra.mxu1 %v2880_v25  ;;  %v81_v1 = vsel %vm37_vm1, %v32_v56, 0  ;;  %v293_v27 = vsub.f32 %v3034_v58, %v292_v7  ;;  %v305_v56 = vand.u32 4294901760, %v304_v45 }
  0x1f   :  { %212 = vmatprep.mubr.f32.mxu0 %v4238_v5  ;;  %436 = vmatprep.mubr.f32.mxu1 %v4238_v5  ;;  %v3057_v18 = vand.u32 4294901760, %v81_v1 }
  0x20   :  { %v294_v40 = vand.u32 4294901760, %v293_v27 }
  0x21   :  { %v3068_v38 = vsub.f32 %v81_v1, %v3057_v18  ;;  %v3094_v1 = vand.u32 4294901760, %v1308_v55 }
  0x22   :  { %218 = vmatmul.mubr.f32.gmra.mxu0 %v217_v8  ;;  %438 = vmatmul.mubr.f32.gmra.mxu1 %v2890_v32  ;;  %v272_v8 = vand.u32 4294901760, %v271_v62 }
  0x23   :  { %223 = vmatprep.mubr.f32.mxu0 %v4238_v5  ;;  %443 = vmatprep.mubr.f32.mxu1 %v4238_v5  ;;  %v3103_v9 = vsub.f32 %v1308_v55, %v3094_v1 }
  0x25   :  { %v1633_v27 = vand.u32 4294901760, %v3103_v9 }
  0x26   :  { %229 = vmatmul.mubr.f32.gmra.mxu0 %v228_v23  ;;  %445 = vmatmul.mubr.f32.gmra.mxu1 %v2908_v43  ;;  %v84_v23 = vsel %vm37_vm1, %v33_v6, 0 }
  0x27   :  { %234 = vmatprep.mubr.f32.mxu0 %v4238_v5  ;;  %450 = vmatprep.mubr.f32.mxu1 %v4238_v5 }
  0x2a   :  { %240 = vmatmul.mubr.f32.gmra.mxu0 %v239_v39  ;;  %452 = vmatmul.mubr.f32.gmra.mxu1 %v2928_v54  ;;  %v3070_v39 = vand.u32 4294901760, %v84_v23 }
  0x2b   :  { %245 = vmatprep.mubr.f32.mxu0 %v4238_v5  ;;  %457 = vmatprep.mubr.f32.mxu1 %v4238_v5 }
  0x2c   :  { %v3080_v49 = vsub.f32 %v84_v23, %v3070_v39 }
  0x2e   :  { %251 = vmatmul.mubr.f32.gmra.mxu0 %v250_v48  ;;  %459 = vmatmul.mubr.f32.gmra.mxu1 %v2945_v61  ;;  %v314_v48 = vand.u32 4294901760, %v3068_v38  ;;  %v325_v62 = vand.u32 4294901760, %v3080_v49 }
  0x2f   :  { %256 = vmatprep.mubr.f32.mxu0 %v4238_v5  ;;  %464 = vmatprep.mubr.f32.mxu1 %v4238_v5 }
  0x32   :  { %262 = vmatmul.mubr.f32.gmra.mxu0 %v261_v59  ;;  %466 = vmatmul.mubr.f32.gmra.mxu1 %v2961_v4  ;;  %v315_v59 = vsub.f32 %v3068_v38, %v314_v48 }
  0x33   :  { %267 = vmatprep.mubr.f32.mxu0 %v4238_v5  ;;  %471 = vmatprep.mubr.f32.mxu1 %v4238_v5 }
  0x34   :  { %v316_v6 = vand.u32 4294901760, %v315_v59 }
  0x36   :  { %273 = vmatmul.mubr.f32.gmra.mxu0 %v272_v8  ;;  %473 = vmatmul.mubr.f32.gmra.mxu1 %v2978_v17  ;;  %v326_v8 = vsub.f32 %v3080_v49, %v325_v62 }
  0x37   :  { %278 = vmatprep.mubr.f32.mxu0 %v4238_v5  ;;  %478 = vmatprep.mubr.f32.mxu1 %v4238_v5 }
  0x38   :  { %v327_v23 = vand.u32 4294901760, %v326_v8 }
  0x3a   :  { %284 = vmatmul.mubr.f32.gmra.mxu0 %v283_v35  ;;  %480 = vmatmul.mubr.f32.gmra.mxu1 %v2985_v19  ;;  %v1634_v35 = vsub.f32 %v3103_v9, %v1633_v27 }
  0x3b   :  { %289 = vmatprep.mubr.f32.mxu0 %v4238_v5  ;;  %485 = vmatprep.mubr.f32.mxu1 %v4238_v5 }
  0x3e   :  { %295 = vmatmul.mubr.f32.gmra.mxu0 %v294_v40  ;;  %487 = vmatmul.mubr.f32.gmra.mxu1 %v3010_v44  ;;  %v1635_v40 = vand.u32 4294901760, %v1634_v35 }
  0x3f   :  { %300 = vmatprep.mubr.f32.mxu0 %v4238_v5  ;;  %492 = vmatprep.mubr.f32.mxu1 %v4238_v5 }
  0x42   :  { %306 = vmatmul.mubr.f32.gmra.mxu0 %v305_v56  ;;  %494 = vmatmul.mubr.f32.gmra.mxu1 %v3017_v46 }
  0x43   :  { %311 = vmatprep.mubr.f32.mxu0 %v4238_v5  ;;  %499 = vmatprep.mubr.f32.mxu1 %v4238_v5 }
  0x46   :  { %317 = vmatmul.mubr.f32.gmra.mxu0 %v316_v6  ;;  %501 = vmatmul.mubr.f32.gmra.mxu1 %v3041_v0 }
  0x47   :  { %322 = vmatprep.mubr.f32.mxu0 %v4238_v5  ;;  %506 = vmatprep.mubr.f32.mxu1 %v4238_v5 }
  0x4a   :  { %328 = vmatmul.mubr.f32.gmra.mxu0 %v327_v23  ;;  %508 = vmatmul.mubr.f32.gmra.mxu1 %v3057_v18 }
  0x4b   :  { %513 = vmatprep.mubr.f32.mxu1 %v4238_v5  ;;  %589 = vmatprep.mubr.f32.mxu0 %v4238_v5 }
  0x4e   :  { %515 = vmatmul.mubr.f32.gmra.mxu1 %v3070_v39  ;;  %592 = vmatmul.mubr.f32.vlgmr.msra.gmra.mxu0 %v2866_v20 }
  0x4f   :  { %597 = vmatprep.mubr.f32.mxu0 %v4238_v5  ;;  %784 = vmatprep.mubr.f32.mxu1 %v4238_v5 }
  0x50   :  { %966 = vmatpush1.msra.mxu0 %v372_v28 }
  0x51   :  { %1389 = vmatprep.subr.mxu0 %v3094_v1 }
  0x52   :  { %600 = vmatmul.mubr.f32.gmra.mxu0 %v2872_v22  ;;  %788 = vmatmul.mubr.f32.vlgmr.msra.gmra.mxu1 %v160_v26 }
  0x53   :  { %1145 = vmatpush1.msra.mxu1 %v2853_v11  ;;  %605 = vmatprep.mubr.f32.mxu0 %v4238_v5  ;;  %v1307_v11 = vld [vmem:[%s4221_s3] sm:$0xff] }
  0x54   :  { %793 = vmatprep.mubr.f32.mxu1 %v4238_v5  ;;  %1636 = vmatprep.subr.mxu1 %v1635_v40  ;;  %v3186_v20 = vand.u32 4294901760, %v1307_v11 }
  0x56   :  { %608 = vmatmul.mubr.f32.gmra.mxu0 %v2878_v24  ;;  %797 = vmatmul.mubr.f32.gmra.mxu1 %v171_v29  ;;  %v3194_v21 = vsub.f32 %v1307_v11, %v3186_v20  ;;  %v1293_v29 = vld [vmem:[%s4219_s1 + $0x10] sm:$0xff] }
  0x57   :  { %613 = vmatprep.mubr.f32.mxu0 %v4238_v5  ;;  %802 = vmatprep.mubr.f32.mxu1 %v4238_v5 }
  0x58   :  { %v4234_v22 = vand.u32 4294901760, %v3194_v21 }
  0x5a   :  { %616 = vmatmul.mubr.f32.gmra.mxu0 %v2888_v31  ;;  %806 = vmatmul.mubr.f32.gmra.mxu1 %v182_v30  ;;  %v1640_v24 = vsub.f32 %v3194_v21, %v4234_v22 }
  0x5b   :  { %621 = vmatprep.mubr.f32.mxu0 %v4238_v5  ;;  %811 = vmatprep.mubr.f32.mxu1 %v4238_v5 }
  0x5c   :  { %v1641_v26 = vand.u32 4294901760, %v1640_v24 }
  0x5e   :  { %624 = vmatmul.mubr.f32.gmra.mxu0 %v2906_v42  ;;  %815 = vmatmul.mubr.f32.gmra.mxu1 %v193_v47  ;;  %v1294_v42 = vld [vmem:[%s4219_s1 + $0x18] sm:$0xff] }
  0x5f   :  { %629 = vmatprep.mubr.f32.mxu0 %v4238_v5  ;;  %820 = vmatprep.mubr.f32.mxu1 %v4238_v5 }
  0x62   :  { %632 = vmatmul.mubr.f32.gmra.mxu0 %v2921_v50  ;;  %824 = vmatmul.mubr.f32.gmra.mxu1 %v204_v53  ;;  %v1320_v53 = vsel %vm1309_vm2, %v1294_v42, 0 }
  0x63   :  { %637 = vmatprep.mubr.f32.mxu0 %v4238_v5  ;;  %829 = vmatprep.mubr.f32.mxu1 %v4238_v5 }
  0x66   :  { %640 = vmatmul.mubr.f32.gmra.mxu0 %v2943_v60  ;;  %833 = vmatmul.mubr.f32.gmra.mxu1 %v215_v57 }
  0x67   :  { %645 = vmatprep.mubr.f32.mxu0 %v4238_v5  ;;  %838 = vmatprep.mubr.f32.mxu1 %v4238_v5 }
  0x6a   :  { %648 = vmatmul.mubr.f32.gmra.mxu0 %v2959_v3  ;;  %842 = vmatmul.mubr.f32.gmra.mxu1 %v226_v2  ;;  %v3311_v2 = vand.u32 4294901760, %v1320_v53 }
  0x6b   :  { %653 = vmatprep.mubr.f32.mxu0 %v4238_v5  ;;  %847 = vmatprep.mubr.f32.mxu1 %v4238_v5 }
  0x6c   :  { %4285 = vst [vmem:[#allocation7_spill] sm:$0xff] %v3311_v2 }
  0x6e   :  { %656 = vmatmul.mubr.f32.gmra.mxu0 %v2976_v15  ;;  %851 = vmatmul.mubr.f32.gmra.mxu1 %v237_v14 }
  0x6f   :  { %661 = vmatprep.mubr.f32.mxu0 %v4238_v5  ;;  %856 = vmatprep.mubr.f32.mxu1 %v4238_v5 }
  0x72   :  { %664 = vmatmul.mubr.f32.gmra.mxu0 %v2993_v34  ;;  %860 = vmatmul.mubr.f32.gmra.mxu1 %v248_v33 }
  0x73   :  { %669 = vmatprep.mubr.f32.mxu0 %v4238_v5  ;;  %865 = vmatprep.mubr.f32.mxu1 %v4238_v5 }
  0x76   :  { %672 = vmatmul.mubr.f32.gmra.mxu0 %v3002_v37  ;;  %869 = vmatmul.mubr.f32.gmra.mxu1 %v259_v41  ;;  %v1297_v37 = vld [vmem:[%s4219_s1 + $0x30] sm:$0xff] }
  0x77   :  { %677 = vmatprep.mubr.f32.mxu0 %v4238_v5  ;;  %874 = vmatprep.mubr.f32.mxu1 %v4238_v5 }
  0x7a   :  { %680 = vmatmul.mubr.f32.gmra.mxu0 %v3025_v52  ;;  %878 = vmatmul.mubr.f32.gmra.mxu1 %v270_v51 }
  0x7b   :  { %685 = vmatprep.mubr.f32.mxu0 %v4238_v5  ;;  %883 = vmatprep.mubr.f32.mxu1 %v4238_v5 }
  0x7e   :  { %688 = vmatmul.mubr.f32.gmra.mxu0 %v3034_v58  ;;  %887 = vmatmul.mubr.f32.gmra.mxu1 %v281_v63  ;;  %v1329_v63 = vsel %vm1309_vm2, %v1297_v37, 0 }
  0x7f   :  { %693 = vmatprep.mubr.f32.mxu0 %v4238_v5  ;;  %892 = vmatprep.mubr.f32.mxu1 %v4238_v5 }
  0x82   :  { %696 = vmatmul.mubr.f32.gmra.mxu0 %v3055_v10  ;;  %896 = vmatmul.mubr.f32.gmra.mxu1 %v292_v7 }
  0x83   :  { %701 = vmatprep.mubr.f32.mxu0 %v4238_v5  ;;  %901 = vmatprep.mubr.f32.mxu1 %v4238_v5 }
  0x86   :  { %704 = vmatmul.mubr.f32.gmra.mxu0 %v3068_v38  ;;  %905 = vmatmul.mubr.f32.gmra.mxu1 %v303_v36 }
  0x87   :  { %709 = vmatprep.mubr.f32.mxu0 %v4238_v5  ;;  %910 = vmatprep.mubr.f32.mxu1 %v4238_v5 }
  0x8a   :  { %712 = vmatmul.mubr.f32.gmra.mxu0 %v3080_v49  ;;  %914 = vmatmul.mubr.f32.gmra.mxu1 %v314_v48 }
  0x8b   :  { %919 = vmatprep.mubr.f32.mxu1 %v4238_v5  ;;  %999 = vmatprep.mubr.f32.mxu0 %v4238_v5 }
  0x8e   :  { %923 = vmatmul.mubr.f32.gmra.mxu1 %v325_v62  ;;  %1001 = vmatmul.mubr.f32.vlgmr.msra.gmra.mxu0 %v2855_v12  ;;  %v1299_v62 = vld [vmem:[%s4219_s1 + $0x40] sm:$0xff] }
  0x8f   :  { %1006 = vmatprep.mubr.f32.mxu0 %v4238_v5  ;;  %1178 = vmatprep.mubr.f32.mxu1 %v4238_v5  ;;  %v1335_v24 = vsel %vm1309_vm2, %v1299_v62, 0 }
  0x90   :  { %1391 = vmatpush1.msra.mxu0 %v3186_v20 }
  0x91   :  { %1820 = vmatprep.subr.mxu0 %v3103_v9 }
  0x92   :  { %1008 = vmatmul.mubr.f32.gmra.mxu0 %v2857_v13  ;;  %1180 = vmatmul.mubr.f32.vlgmr.msra.gmra.mxu1 %v2855_v12  ;;  %v1291_v12 = vld [vmem:[%s4219_s1] sm:$0xff] }
  0x93   :  { %1642 = vmatpush1.msra.mxu1 %v1641_v26  ;;  %1013 = vmatprep.mubr.f32.mxu0 %v4238_v5 }
  0x94   :  { %1185 = vmatprep.mubr.f32.mxu1 %v4238_v5  ;;  %2016 = vmatprep.subr.mxu1 %v3094_v1 }
  0x96   :  { %1015 = vmatmul.mubr.f32.gmra.mxu0 %v2861_v16  ;;  %1187 = vmatmul.mubr.f32.gmra.mxu1 %v2857_v13  ;;  %v1311_v13 = vsel %vm1309_vm2, %v1291_v12, 0 }
  0x97   :  { %1020 = vmatprep.mubr.f32.mxu0 %v4238_v5  ;;  %1192 = vmatprep.mubr.f32.mxu1 %v4238_v5 }
  0x9a   :  { %1022 = vmatmul.mubr.f32.gmra.mxu0 %v2880_v25  ;;  %1194 = vmatmul.mubr.f32.gmra.mxu1 %v2861_v16  ;;  %v1292_v16 = vld [vmem:[%s4219_s1 + $0x8] sm:$0xff] }
  0x9b   :  { %1027 = vmatprep.mubr.f32.mxu0 %v4238_v5  ;;  %1199 = vmatprep.mubr.f32.mxu1 %v4238_v5  ;;  %v1314_v28 = vsel %vm1309_vm2, %v1292_v16, 0 }
  0x9c   :  { %v3275_v30 = vand.u32 4294901760, %v1314_v28 }
  0x9e   :  { %1029 = vmatmul.mubr.f32.gmra.mxu0 %v2890_v32  ;;  %1201 = vmatmul.mubr.f32.gmra.mxu1 %v2880_v25  ;;  %v3267_v25 = vand.u32 4294901760, %v1311_v13  ;;  %4283 = vst [vmem:[#allocation5_spill] sm:$0xff] %v3275_v30 }
  0x9f   :  { %1034 = vmatprep.mubr.f32.mxu0 %v4238_v5  ;;  %1206 = vmatprep.mubr.f32.mxu1 %v4238_v5 }
  0xa0   :  { %v3280_v31 = vsub.f32 %v1311_v13, %v3267_v25  ;;  %v1300_v13 = vld [vmem:[%s4219_s1 + $0x48] sm:$0xff] }
  0xa2   :  { %1036 = vmatmul.mubr.f32.gmra.mxu0 %v2908_v43  ;;  %1208 = vmatmul.mubr.f32.gmra.mxu1 %v2890_v32  ;;  %v1317_v32 = vsel %vm1309_vm2, %v1293_v29, 0  ;;  %v4233_v50 = vand.u32 4294901760, %v3280_v31 }
  0xa3   :  { %1041 = vmatprep.mubr.f32.mxu0 %v4238_v5  ;;  %1213 = vmatprep.mubr.f32.mxu1 %v4238_v5  ;;  %v3291_v47 = vand.u32 4294901760, %v1317_v32 }
  0xa5   :  { %4284 = vst [vmem:[#allocation6_spill] sm:$0xff] %v3291_v47  ;;  %v3304_v60 = vsub.f32 %v1317_v32, %v3291_v47 }
  0xa6   :  { %1043 = vmatmul.mubr.f32.gmra.mxu0 %v2928_v54  ;;  %1215 = vmatmul.mubr.f32.gmra.mxu1 %v2908_v43  ;;  %v3289_v43 = vsub.f32 %v1314_v28, %v3275_v30 }
  0xa7   :  { %1048 = vmatprep.mubr.f32.mxu0 %v4238_v5  ;;  %1220 = vmatprep.mubr.f32.mxu1 %v4238_v5  ;;  %v4231_v15 = vand.u32 4294901760, %v3304_v60 }
  0xa8   :  { %v4232_v57 = vand.u32 4294901760, %v3289_v43 }
  0xaa   :  { %1050 = vmatmul.mubr.f32.gmra.mxu0 %v2945_v61  ;;  %1222 = vmatmul.mubr.f32.gmra.mxu1 %v2928_v54  ;;  %v1295_v54 = vld [vmem:[%s4219_s1 + $0x20] sm:$0xff]  ;;  %v1439_v14 = vsub.f32 %v3289_v43, %v4232_v57 }
  0xab   :  { %1055 = vmatprep.mubr.f32.mxu0 %v4238_v5  ;;  %1227 = vmatprep.mubr.f32.mxu1 %v4238_v5  ;;  %v1323_v3 = vsel %vm1309_vm2, %v1295_v54, 0 }
  0xac   :  { %v3328_v33 = vand.u32 4294901760, %v1323_v3  ;;  %v1440_v41 = vand.u32 4294901760, %v1439_v14 }
  0xae   :  { %1057 = vmatmul.mubr.f32.gmra.mxu0 %v2961_v4  ;;  %1229 = vmatmul.mubr.f32.gmra.mxu1 %v2945_v61  ;;  %v1428_v61 = vsub.f32 %v3280_v31, %v4233_v50  ;;  %4286 = vst [vmem:[#allocation8_spill] sm:$0xff] %v3328_v33  ;;  %v3342_v52 = vsub.f32 %v1323_v3, %v3328_v33 }
  0xaf   :  { %1062 = vmatprep.mubr.f32.mxu0 %v4238_v5  ;;  %1234 = vmatprep.mubr.f32.mxu1 %v4238_v5 }
  0xb0   :  { %v4228_v45 = vand.u32 4294901760, %v3342_v52 }
  0xb2   :  { %1064 = vmatmul.mubr.f32.gmra.mxu0 %v2978_v17  ;;  %1236 = vmatmul.mubr.f32.gmra.mxu1 %v2961_v4  ;;  %v1296_v4 = vld [vmem:[%s4219_s1 + $0x28] sm:$0xff]  ;;  %v1472_v40 = vsub.f32 %v3342_v52, %v4228_v45 }
  0xb3   :  { %1069 = vmatprep.mubr.f32.mxu0 %v4238_v5  ;;  %1241 = vmatprep.mubr.f32.mxu1 %v4238_v5  ;;  %v1326_v34 = vsel %vm1309_vm2, %v1296_v4, 0  ;;  %v1338_v4 = vsel %vm1309_vm2, %v1300_v13, 0 }
  0xb4   :  { %v3344_v58 = vand.u32 4294901760, %v1326_v34 }
  0xb6   :  { %1071 = vmatmul.mubr.f32.gmra.mxu0 %v2985_v19  ;;  %1243 = vmatmul.mubr.f32.gmra.mxu1 %v2978_v17  ;;  %v1429_v17 = vand.u32 4294901760, %v1428_v61  ;;  %4287 = vst [vmem:[#allocation9_spill] sm:$0xff] %v3344_v58  ;;  %v3363_v48 = vsub.f32 %v1326_v34, %v3344_v58  ;;  %v3405_v61 = vand.u32 4294901760, %v1335_v24  ;;  %v1301_v34 = vld [vmem:[%s4219_s1 + $0x50] sm:$0xff] }
  0xb7   :  { %1076 = vmatprep.mubr.f32.mxu0 %v4238_v5  ;;  %1248 = vmatprep.mubr.f32.mxu1 %v4238_v5 }
  0xb8   :  { %v4227_v11 = vand.u32 4294901760, %v3363_v48  ;;  %4290 = vst [vmem:[#allocation12_spill] sm:$0xff] %v3405_v61 }
  0xba   :  { %1078 = vmatmul.mubr.f32.gmra.mxu0 %v3010_v44  ;;  %1250 = vmatmul.mubr.f32.gmra.mxu1 %v2985_v19  ;;  %v3326_v19 = vsub.f32 %v1320_v53, %v3311_v2  ;;  %v1473_v53 = vand.u32 4294901760, %v1472_v40  ;;  %v1483_v54 = vsub.f32 %v3363_v48, %v4227_v11 }
  0xbb   :  { %1083 = vmatprep.mubr.f32.mxu0 %v4238_v5  ;;  %1255 = vmatprep.mubr.f32.mxu1 %v4238_v5 }
  0xbc   :  { %v4229_v51 = vand.u32 4294901760, %v3326_v19 }
  0xbe   :  { %1085 = vmatmul.mubr.f32.gmra.mxu0 %v3017_v46  ;;  %1257 = vmatmul.mubr.f32.gmra.mxu1 %v3010_v44  ;;  %v1450_v44 = vsub.f32 %v3304_v60, %v4231_v15 }
  0xbf   :  { %1090 = vmatprep.mubr.f32.mxu0 %v4238_v5  ;;  %1262 = vmatprep.mubr.f32.mxu1 %v4238_v5 }
  0xc0   :  { %v1451_v10 = vand.u32 4294901760, %v1450_v44 }
  0xc2   :  { %1092 = vmatmul.mubr.f32.gmra.mxu0 %v3041_v0  ;;  %1264 = vmatmul.mubr.f32.gmra.mxu1 %v3017_v46 }
  0xc3   :  { %1097 = vmatprep.mubr.f32.mxu0 %v4238_v5  ;;  %1269 = vmatprep.mubr.f32.mxu1 %v4238_v5 }
  0xc6   :  { %1099 = vmatmul.mubr.f32.gmra.mxu0 %v3057_v18  ;;  %1271 = vmatmul.mubr.f32.gmra.mxu1 %v3041_v0  ;;  %v1298_v0 = vld [vmem:[%s4219_s1 + $0x38] sm:$0xff] }
  0xc7   :  { %1104 = vmatprep.mubr.f32.mxu0 %v4238_v5  ;;  %1276 = vmatprep.mubr.f32.mxu1 %v4238_v5  ;;  %v1332_v49 = vsel %vm1309_vm2, %v1298_v0, 0  ;;  %v1484_v0 = vand.u32 4294901760, %v1483_v54 }
  0xc8   :  { %v3380_v9 = vand.u32 4294901760, %v1332_v49 }
  0xca   :  { %1106 = vmatmul.mubr.f32.gmra.mxu0 %v3070_v39  ;;  %1278 = vmatmul.mubr.f32.gmra.mxu1 %v3057_v18  ;;  %v3353_v18 = vand.u32 4294901760, %v1329_v63  ;;  %4289 = vst [vmem:[#allocation11_spill] sm:$0xff] %v3380_v9  ;;  %v3399_v29 = vsub.f32 %v1332_v49, %v3380_v9 }
  0xcb   :  { %1283 = vmatprep.mubr.f32.mxu1 %v4238_v5  ;;  %1424 = vmatprep.mubr.f32.mxu0 %v4238_v5 }
  0xcc   :  { %4288 = vst [vmem:[#allocation10_spill] sm:$0xff] %v3353_v18  ;;  %v3378_v8 = vsub.f32 %v1329_v63, %v3353_v18  ;;  %v4224_v44 = vand.u32 4294901760, %v3399_v29 }
  0xce   :  { %v164_v46 = vpop.f32.mrf.mxu0  ;;  %1285 = vmatmul.mubr.f32.gmra.mxu1 %v3070_v39  ;;  %1430 = vmatmul.mubr.f32.vlgmr.msra.gmra.mxu0 %v1429_v17  ;;  %v1461_v39 = vsub.f32 %v3326_v19, %v4229_v51  ;;  %v4226_v28 = vand.u32 4294901760, %v3378_v8 }
  0xcf   :  { %1435 = vmatprep.mubr.f32.mxu0 %v4238_v5  ;;  %1675 = vmatprep.mubr.f32.mxu1 %v4238_v5 }
  0xd0   :  { %v166_v7 = vpop.f32.mrf.mxu0  ;;  %1823 = vmatpush1.msra.mxu0 %v3194_v21  ;;  %v1462_v35 = vand.u32 4294901760, %v1461_v39  ;;  %v1302_v39 = vld [vmem:[%s4219_s1 + $0x58] sm:$0xff] }
  0xd1   :  { %2229 = vmatprep.subr.mxu0 %v1633_v27 }
  0xd2   :  { %v175_v36 = vpop.f32.mrf.mxu0  ;;  %v411_v38 = vpop.f32.mrf.mxu1  ;;  %1441 = vmatmul.mubr.f32.gmra.mxu0 %v1440_v41  ;;  %1677 = vmatmul.mubr.f32.vlgmr.msra.gmra.mxu1 %v3267_v25  ;;  %v1494_v41 = vsub.f32 %v3378_v8, %v4226_v28 }
  0xd3   :  { %v3366_v55 = vadd.f32 %v411_v38, %v164_v46  ;;  %2018 = vmatpush1.msra.mxu1 %v3186_v20  ;;  %1446 = vmatprep.mubr.f32.mxu0 %v4238_v5  ;;  %v1341_v38 = vsel %vm1309_vm2, %v1301_v34, 0 }
  0xd4   :  { %v177_v56 = vpop.f32.mrf.mxu0  ;;  %v413_v59 = vpop.f32.mrf.mxu1  ;;  %1682 = vmatprep.mubr.f32.mxu1 %v4238_v5  ;;  %2410 = vmatprep.subr.mxu1 %v3094_v1  ;;  %v1495_v62 = vand.u32 4294901760, %v1494_v41 }
  0xd5   :  { %v3375_v6 = vadd.f32 %v413_v59, %v166_v7  ;;  %v3423_v7 = vsub.f32 %v1335_v24, %v3405_v61 }
  0xd6   :  { %v186_v23 = vpop.f32.mrf.mxu0  ;;  %v418_v27 = vpop.f32.mrf.mxu1  ;;  %1452 = vmatmul.mubr.f32.gmra.mxu0 %v1451_v10  ;;  %1684 = vmatmul.mubr.f32.gmra.mxu1 %v3275_v30  ;;  %v3425_v10 = vand.u32 4294901760, %v1338_v4 }
  0xd7   :  { %v3387_v1 = vadd.f32 %v418_v27, %v175_v36  ;;  %1457 = vmatprep.mubr.f32.mxu0 %v4238_v5  ;;  %1689 = vmatprep.mubr.f32.mxu1 %v4238_v5  ;;  %v4223_v40 = vand.u32 4294901760, %v3423_v7 }
  0xd8   :  { %v188_v26 = vpop.f32.mrf.mxu0  ;;  %v420_v12 = vpop.f32.mrf.mxu1  ;;  %4291 = vst [vmem:[#allocation13_spill] sm:$0xff] %v3425_v10  ;;  %v3443_v24 = vsub.f32 %v1338_v4, %v3425_v10 }
  0xd9   :  { %v3395_v16 = vadd.f32 %v420_v12, %v177_v56  ;;  %v1344_v12 = vsel %vm1309_vm2, %v1302_v39, 0  ;;  %v1516_v41 = vsub.f32 %v3423_v7, %v4223_v40 }
  0xda   :  { %v197_v32 = vpop.f32.mrf.mxu0  ;;  %v425_v42 = vpop.f32.mrf.mxu1  ;;  %1463 = vmatmul.mubr.f32.gmra.mxu0 %v1462_v35  ;;  %1691 = vmatmul.mubr.f32.gmra.mxu1 %v3291_v47  ;;  %v3457_v4 = vand.u32 4294901760, %v1344_v12 }
  0xdb   :  { %v3407_v3 = vadd.f32 %v425_v42, %v186_v23  ;;  %1468 = vmatprep.mubr.f32.mxu0 %v4238_v5  ;;  %1696 = vmatprep.mubr.f32.mxu1 %v4238_v5  ;;  %v1505_v23 = vsub.f32 %v3399_v29, %v4224_v44 }
  0xdc   :  { %v199_v14 = vpop.f32.mrf.mxu0  ;;  %v427_v17 = vpop.f32.mrf.mxu1  ;;  %4293 = vst [vmem:[#allocation15_spill] sm:$0xff] %v3457_v4 }
  0xdd   :  { %v3415_v37 = vadd.f32 %v427_v17, %v188_v26  ;;  %v3445_v26 = vand.u32 4294901760, %v1341_v38  ;;  %v1506_v34 = vand.u32 4294901760, %v1505_v23 }
  0xde   :  { %v208_v46 = vpop.f32.mrf.mxu0  ;;  %v432_v63 = vpop.f32.mrf.mxu1  ;;  %1474 = vmatmul.mubr.f32.gmra.mxu0 %v1473_v53  ;;  %1698 = vmatmul.mubr.f32.gmra.mxu1 %v3311_v2  ;;  %v1303_v53 = vld [vmem:[%s4219_s1 + $0x60] sm:$0xff] }
  0xdf   :  { %v3427_v36 = vadd.f32 %v432_v63, %v197_v32  ;;  %1479 = vmatprep.mubr.f32.mxu0 %v4238_v5  ;;  %1703 = vmatprep.mubr.f32.mxu1 %v4238_v5  ;;  %4292 = vst [vmem:[#allocation14_spill] sm:$0xff] %v3445_v26  ;;  %v3465_v63 = vsub.f32 %v1341_v38, %v3445_v26  ;;  %v1347_v39 = vsel %vm1309_vm2, %v1303_v53, 0 }
  0xe0   :  { %v210_v49 = vpop.f32.mrf.mxu0  ;;  %v434_v56 = vpop.f32.mrf.mxu1  ;;  %v3485_v40 = vand.u32 4294901760, %v1347_v39 }
  0xe1   :  { %v3435_v59 = vadd.f32 %v434_v56, %v199_v14 }
  0xe2   :  { %v219_v27 = vpop.f32.mrf.mxu0  ;;  %v439_v35 = vpop.f32.mrf.mxu1  ;;  %1485 = vmatmul.mubr.f32.gmra.mxu0 %v1484_v0  ;;  %1705 = vmatmul.mubr.f32.gmra.mxu1 %v3328_v33  ;;  %4294 = vst [vmem:[#allocation16_spill] sm:$0xff] %v3485_v40 }
  0xe3   :  { %v3448_v13 = vadd.f32 %v439_v35, %v208_v46  ;;  %1490 = vmatprep.mubr.f32.mxu0 %v4238_v5  ;;  %1710 = vmatprep.mubr.f32.mxu1 %v4238_v5  ;;  %v4225_v46 = vand.u32 4294901760, %v3443_v24  ;;  %v3478_v35 = vsub.f32 %v1344_v12, %v3457_v4 }
  0xe4   :  { %v221_v32 = vpop.f32.mrf.mxu0  ;;  %v441_v42 = vpop.f32.mrf.mxu1 }
  0xe5   :  { %v3455_v54 = vadd.f32 %v441_v42, %v210_v49  ;;  %v1517_v42 = vand.u32 4294901760, %v1516_v41  ;;  %v1527_v53 = vsub.f32 %v3443_v24, %v4225_v46  ;;  %v1305_v41 = vld [vmem:[%s4219_s1 + $0x70] sm:$0xff]  ;;  %v4235_v46 = vand.u32 4294901760, %v3478_v35 }
  0xe6   :  { %v230_v14 = vpop.f32.mrf.mxu0  ;;  %v446_v17 = vpop.f32.mrf.mxu1  ;;  %1496 = vmatmul.mubr.f32.gmra.mxu0 %v1495_v62  ;;  %1712 = vmatmul.mubr.f32.gmra.mxu1 %v3344_v58  ;;  %v1304_v62 = vld [vmem:[%s4219_s1 + $0x68] sm:$0xff] }
  0xe7   :  { %v3467_v0 = vadd.f32 %v446_v17, %v219_v27  ;;  %1501 = vmatprep.mubr.f32.mxu0 %v4238_v5  ;;  %1717 = vmatprep.mubr.f32.mxu1 %v4238_v5  ;;  %v4230_v17 = vand.u32 4294901760, %v3465_v63  ;;  %v1350_v12 = vsel %vm1309_vm2, %v1304_v62, 0 }
  0xe8   :  { %v232_v49 = vpop.f32.mrf.mxu0  ;;  %v448_v56 = vpop.f32.mrf.mxu1  ;;  %v3505_v45 = vand.u32 4294901760, %v1350_v12 }
  0xe9   :  { %v3475_v23 = vadd.f32 %v448_v56, %v221_v32  ;;  %v1538_v62 = vsub.f32 %v3465_v63, %v4230_v17 }
  0xea   :  { %v241_v38 = vpop.f32.mrf.mxu0  ;;  %v453_v27 = vpop.f32.mrf.mxu1  ;;  %1507 = vmatmul.mubr.f32.gmra.mxu0 %v1506_v34  ;;  %1719 = vmatmul.mubr.f32.gmra.mxu1 %v3353_v18  ;;  %v3523_v57 = vsub.f32 %v1350_v12, %v3505_v45 }
  0xeb   :  { %v3487_v44 = vadd.f32 %v453_v27, %v230_v14  ;;  %1512 = vmatprep.mubr.f32.mxu0 %v4238_v5  ;;  %1724 = vmatprep.mubr.f32.mxu1 %v4238_v5  ;;  %v1528_v14 = vand.u32 4294901760, %v1527_v53  ;;  %v3503_v27 = vsub.f32 %v1347_v39, %v3485_v40  ;;  %v1306_v53 = vld [vmem:[%s4219_s1 + $0x78] sm:$0xff]  ;;  %v1549_v39 = vsub.f32 %v3478_v35, %v4235_v46  ;;  %s2804_s1 = smov [#allocation2]  }
  0xec   :  { %v243_v32 = vpop.f32.mrf.mxu0  ;;  %v455_v34 = vpop.f32.mrf.mxu1  ;;  %v1539_v15 = vand.u32 4294901760, %v1538_v62  ;;  %s2768_s26 = sshll.u32 %s2804_s1, 4  ;;  %s2769_s26 = int_to_ptr.vmem [resolvable:$true] %s2768_s26 }
  0xed   :  { %v3495_v56 = vadd.f32 %v455_v34, %v232_v49  ;;  %v1353_v49 = vsel %vm1309_vm2, %v1305_v41, 0  ;;  %v1550_v62 = vand.u32 4294901760, %v1549_v39  ;;  %v4296_v12 = vand.u32 4294901760, %v3503_v27  ;;  %s2780_s27 = scalar_lea.vmem %s2769_s26, 64  ;;  %p2785_p1 = scmp.lt.s32.totalorder %s2769_s26, %s2769_s26 }
  0xee   :  { %v252_v28 = vpop.f32.mrf.mxu0  ;;  %v460_v11 = vpop.f32.mrf.mxu1  ;;  %1518 = vmatmul.mubr.f32.gmra.mxu0 %v1517_v42  ;;  %1726 = vmatmul.mubr.f32.gmra.mxu1 %v3380_v9  ;;  %v3525_v50 = vand.u32 4294901760, %v1353_v49  ;;  %p2781_p0 = scmp.ne.s32.totalorder %s2769_s26, %s2780_s27  ;;  %p2786_p2 = scmp.lt.s32.totalorder %s2780_s27, %s2780_s27 }
  0xef   :  { %v3507_v51 = vadd.f32 %v460_v11, %v241_v38  ;;  %1523 = vmatprep.mubr.f32.mxu0 %v4238_v5  ;;  %1731 = vmatprep.mubr.f32.mxu1 %v4238_v5 }
  0xf0   :  { %v254_v42 = vpop.f32.mrf.mxu0  ;;  %v462_v34 = vpop.f32.mrf.mxu1  ;;  %4295 = vst [vmem:[#allocation17_spill] sm:$0xff] %v3525_v50  ;;  %p2787_p3 = por %p2786_p2, %p2785_p1 }
  0xf1   :  { %v3515_v17 = vadd.f32 %v462_v34, %v243_v32  ;;  %v1356_v32 = vsel %vm1309_vm2, %v1306_v53, 0 }
  0xf2   :  { %v263_v11 = vpop.f32.mrf.mxu0  ;;  %v467_v38 = vpop.f32.mrf.mxu1  ;;  %1529 = vmatmul.mubr.f32.gmra.mxu0 %v1528_v14  ;;  %1733 = vmatmul.mubr.f32.gmra.mxu1 %v3405_v61  ;;  %v3542_v53 = vand.u32 4294901760, %v1356_v32  ;;  %p2788_p4 = pnand %p2787_p3, %p2781_p0 }
  0xf3   :  { %v3527_v22 = vadd.f32 %v467_v38, %v252_v28  ;;  %1534 = vmatprep.mubr.f32.mxu0 %v4238_v5  ;;  %1738 = vmatprep.mubr.f32.mxu1 %v4238_v5  ;;  %v1560_v28 = vsub.f32 %v3503_v27, %v4296_v12  ;;  %v4250_v38 = vand.u32 4294901760, %v3523_v57  ;;  %v3540_v5 = vsub.f32 %v1353_v49, %v3525_v50 }
  0xf4   :  { %v265_v34 = vpop.f32.mrf.mxu0  ;;  %v469_v14 = vpop.f32.mrf.mxu1  ;;  %4297 = vst [vmem:[#allocation18_spill] sm:$0xff] %v3542_v53 }
  0xf5   :  { %v3532_v46 = vadd.f32 %v469_v14, %v254_v42  ;;  %v4298_v42 = vmov 0.0   ;;  %v1561_v12 = vand.u32 4294901760, %v1560_v28  ;;  %v1571_v49 = vsub.f32 %v3523_v57, %v4250_v38 }
  0xf6   :  { %v274_v61 = vpop.f32.mrf.mxu0  ;;  %v474_v41 = vpop.f32.mrf.mxu1  ;;  %1540 = vmatmul.mubr.f32.gmra.mxu0 %v1539_v15  ;;  %1740 = vmatmul.mubr.f32.gmra.mxu1 %v3425_v10 }
  0xf7   :  { %v3544_v9 = vadd.f32 %v474_v41, %v263_v11  ;;  %1545 = vmatprep.mubr.f32.mxu0 %v4298_v42  ;;  %1745 = vmatprep.mubr.f32.mxu1 %v4298_v42  ;;  %v4255_v11 = vand.u32 4294901760, %v3540_v5  ;;  %v3556_v41 = vsub.f32 %v1356_v32, %v3542_v53  ;;  %v1572_v38 = vand.u32 4294901760, %v1571_v49 }
  0xf8   :  { %v276_v15 = vpop.f32.mrf.mxu0  ;;  %v476_v39 = vpop.f32.mrf.mxu1 }
  0xf9   :  { %v3548_v14 = vadd.f32 %v476_v39, %v265_v34  ;;  %v1582_v32 = vsub.f32 %v3540_v5, %v4255_v11 }
  0xfa   :  { %v285_v10 = vpop.f32.mrf.mxu0  ;;  %v481_v18 = vpop.f32.mrf.mxu1  ;;  %1551 = vmatmul.mubr.f32.gmra.mxu0 %v1550_v62  ;;  %1747 = vmatmul.mubr.f32.gmra.mxu1 %v3445_v26 }
  0xfb   :  { %v3558_v58 = vadd.f32 %v481_v18, %v274_v61  ;;  %1556 = vmatprep.mubr.f32.mxu0 %v4298_v42  ;;  %1752 = vmatprep.mubr.f32.mxu1 %v4298_v42  ;;  %v4260_v18 = vand.u32 4294901760, %v3556_v41  ;;  %v1583_v49 = vand.u32 4294901760, %v1582_v32 }
  0xfc   :  { %v287_v34 = vpop.f32.mrf.mxu0  ;;  %v483_v62 = vpop.f32.mrf.mxu1 }
  0xfd   :  { %v3562_v39 = vadd.f32 %v483_v62, %v276_v15  ;;  %v1593_v11 = vsub.f32 %v3556_v41, %v4260_v18 }
  0xfe   :  { %v296_v28 = vpop.f32.mrf.mxu0  ;;  %v488_v26 = vpop.f32.mrf.mxu1  ;;  %1562 = vmatmul.mubr.f32.gmra.mxu0 %v1561_v12  ;;  %1754 = vmatmul.mubr.f32.gmra.mxu1 %v3457_v4 }
  0xff   :  { %v3569_v61 = vadd.f32 %v488_v26, %v285_v10  ;;  %1567 = vmatprep.mubr.f32.mxu0 %v4298_v42  ;;  %1759 = vmatprep.mubr.f32.mxu1 %v4298_v42 }
 0x100   :  { %v298_v15 = vpop.f32.mrf.mxu0  ;;  %v490_v62 = vpop.f32.mrf.mxu1 }
 0x101   :  { %v3573_v33 = vadd.f32 %v490_v62, %v287_v34 }
 0x102   :  { %v307_v12 = vpop.f32.mrf.mxu0  ;;  %v495_v2 = vpop.f32.mrf.mxu1  ;;  %1573 = vmatmul.mubr.f32.gmra.mxu0 %v1572_v38  ;;  %1761 = vmatmul.mubr.f32.gmra.mxu1 %v3485_v40  ;;  %v1594_v38 = vand.u32 4294901760, %v1593_v11 }
 0x103   :  { %v3579_v10 = vadd.f32 %v495_v2, %v296_v28  ;;  %1578 = vmatprep.mubr.f32.mxu0 %v4298_v42  ;;  %1766 = vmatprep.mubr.f32.mxu1 %v4298_v42 }
 0x104   :  { %v309_v26 = vpop.f32.mrf.mxu0  ;;  %v497_v4 = vpop.f32.mrf.mxu1 }
 0x105   :  { %v3583_v34 = vadd.f32 %v497_v4, %v298_v15 }
 0x106   :  { %v318_v62 = vpop.f32.mrf.mxu0  ;;  %v502_v47 = vpop.f32.mrf.mxu1  ;;  %1584 = vmatmul.mubr.f32.gmra.mxu0 %v1583_v49  ;;  %1768 = vmatmul.mubr.f32.gmra.mxu1 %v3505_v45 }
 0x107   :  { %v3586_v32 = vadd.f32 %v502_v47, %v307_v12  ;;  %1589 = vmatprep.mubr.f32.mxu0 %v4298_v42  ;;  %1773 = vmatprep.mubr.f32.mxu1 %v4298_v42 }
 0x108   :  { %v320_v2 = vpop.f32.mrf.mxu0  ;;  %v504_v28 = vpop.f32.mrf.mxu1 }
 0x109   :  { %v3590_v18 = vadd.f32 %v504_v28, %v309_v26  ;;  %v4299_v28 = vand.u32 4294901760, %v3194_v21 }
 0x10a   :  { %v329_v40 = vpop.f32.mrf.mxu0  ;;  %v509_v30 = vpop.f32.mrf.mxu1  ;;  %1595 = vmatmul.mubr.f32.gmra.mxu0 %v1594_v38  ;;  %1775 = vmatmul.mubr.f32.gmra.mxu1 %v3525_v50 }
 0x10b   :  { %v3593_v4 = vadd.f32 %v509_v30, %v318_v62  ;;  %1780 = vmatprep.mubr.f32.mxu1 %v4298_v42  ;;  %1856 = vmatprep.mubr.f32.mxu0 %v4298_v42 }
 0x10c   :  { %v331_v47 = vpop.f32.mrf.mxu0  ;;  %v511_v11 = vpop.f32.mrf.mxu1 }
 0x10d   :  { %v3597_v15 = vadd.f32 %v511_v11, %v320_v2 }
 0x10e   :  { %v516_v12 = vpop.f32.mrf.mxu1  ;;  %v593_v49 = vpop.f32.mrf.mxu0  ;;  %1782 = vmatmul.mubr.f32.gmra.mxu1 %v3542_v53  ;;  %1859 = vmatmul.mubr.f32.vlgmr.msra.gmra.mxu0 %v3280_v31 }
 0x10f   :  { %v3601_v26 = vadd.f32 %v516_v12, %v329_v40  ;;  %v594_v38 = vadd.f32 %v593_v49, %v3366_v55  ;;  %1864 = vmatprep.mubr.f32.mxu0 %v4298_v42  ;;  %2051 = vmatprep.mubr.f32.mxu1 %v4298_v42  ;;  %v4300_v40 = vand.u32 4294901760, %v3280_v31  ;;  %v4301_v31 = vand.u32 4294901760, %v3289_v43 }
 0x110   :  { %v518_v30 = vpop.f32.mrf.mxu1  ;;  %v595_v62 = vpop.f32.mrf.mxu0  ;;  %2233 = vmatpush1.msra.mxu0 %v4299_v28 }
 0x111   :  { %v3608_v2 = vadd.f32 %v518_v30, %v331_v47  ;;  %v596_v11 = vadd.f32 %v595_v62, %v3375_v6 }
 0x112   :  { %v601_v53 = vpop.f32.mrf.mxu0  ;;  %v789_v50 = vpop.f32.mrf.mxu1  ;;  %1867 = vmatmul.mubr.f32.gmra.mxu0 %v3289_v43  ;;  %2055 = vmatmul.mubr.f32.vlgmr.msra.gmra.mxu1 %v4300_v40  ;;  %v4302_v43 = vand.u32 4294901760, %v3304_v60 }
 0x113   :  { %v602_v55 = vadd.f32 %v601_v53, %v3387_v1  ;;  %v3615_v12 = vadd.f32 %v789_v50, %v594_v38  ;;  %2412 = vmatpush1.msra.mxu1 %v3186_v20  ;;  %1872 = vmatprep.mubr.f32.mxu0 %v4298_v42 }
 0x114   :  { %v603_v21 = vpop.f32.mrf.mxu0  ;;  %v791_v47 = vpop.f32.mrf.mxu1  ;;  %2060 = vmatprep.mubr.f32.mxu1 %v4298_v42 }
 0x115   :  { %v604_v6 = vadd.f32 %v603_v21, %v3395_v16  ;;  %v3621_v49 = vadd.f32 %v791_v47, %v596_v11 }
 0x116   :  { %v609_v30 = vpop.f32.mrf.mxu0  ;;  %v798_v62 = vpop.f32.mrf.mxu1  ;;  %1875 = vmatmul.mubr.f32.gmra.mxu0 %v3304_v60  ;;  %2064 = vmatmul.mubr.f32.gmra.mxu1 %v4301_v31  ;;  %v4303_v60 = vand.u32 4294901760, %v3326_v19 }
 0x117   :  { %v610_v50 = vadd.f32 %v609_v30, %v3407_v3  ;;  %v3627_v20 = vadd.f32 %v798_v62, %v602_v55  ;;  %1880 = vmatprep.mubr.f32.mxu0 %v4298_v42  ;;  %2069 = vmatprep.mubr.f32.mxu1 %v4298_v42 }
 0x118   :  { %v611_v1 = vpop.f32.mrf.mxu0  ;;  %v800_v53 = vpop.f32.mrf.mxu1 }
 0x119   :  { %v612_v16 = vadd.f32 %v611_v1, %v3415_v37  ;;  %v3632_v38 = vadd.f32 %v800_v53, %v604_v6 }
 0x11a   :  { %v617_v28 = vpop.f32.mrf.mxu0  ;;  %v807_v11 = vpop.f32.mrf.mxu1  ;;  %1883 = vmatmul.mubr.f32.gmra.mxu0 %v3326_v19  ;;  %2073 = vmatmul.mubr.f32.gmra.mxu1 %v4302_v43  ;;  %v4304_v19 = vand.u32 4294901760, %v3342_v52 }
 0x11b   :  { %v618_v3 = vadd.f32 %v617_v28, %v3427_v36  ;;  %v3638_v40 = vadd.f32 %v807_v11, %v610_v50  ;;  %1888 = vmatprep.mubr.f32.mxu0 %v4298_v42  ;;  %2078 = vmatprep.mubr.f32.mxu1 %v4298_v42 }
 0x11c   :  { %v619_v55 = vpop.f32.mrf.mxu0  ;;  %v809_v21 = vpop.f32.mrf.mxu1 }
 0x11d   :  { %v620_v37 = vadd.f32 %v619_v55, %v3435_v59  ;;  %v3643_v47 = vadd.f32 %v809_v21, %v612_v16 }
 0x11e   :  { %v625_v6 = vpop.f32.mrf.mxu0  ;;  %v816_v30 = vpop.f32.mrf.mxu1  ;;  %1891 = vmatmul.mubr.f32.gmra.mxu0 %v3342_v52  ;;  %2082 = vmatmul.mubr.f32.gmra.mxu1 %v4303_v60  ;;  %v4305_v52 = vand.u32 4294901760, %v3363_v48 }
 0x11f   :  { %v626_v36 = vadd.f32 %v625_v6, %v3448_v13  ;;  %v3649_v62 = vadd.f32 %v816_v30, %v618_v3  ;;  %1896 = vmatprep.mubr.f32.mxu0 %v4298_v42  ;;  %2087 = vmatprep.mubr.f32.mxu1 %v4298_v42 }
 0x120   :  { %v627_v31 = vpop.f32.mrf.mxu0  ;;  %v818_v50 = vpop.f32.mrf.mxu1 }
 0x121   :  { %v628_v59 = vadd.f32 %v627_v31, %v3455_v54  ;;  %v3654_v1 = vadd.f32 %v818_v50, %v620_v37 }
 0x122   :  { %v633_v53 = vpop.f32.mrf.mxu0  ;;  %v825_v16 = vpop.f32.mrf.mxu1  ;;  %1899 = vmatmul.mubr.f32.gmra.mxu0 %v3363_v48  ;;  %2091 = vmatmul.mubr.f32.gmra.mxu1 %v4304_v19  ;;  %v4306_v48 = vand.u32 4294901760, %v3378_v8 }
 0x123   :  { %v634_v13 = vadd.f32 %v633_v53, %v3467_v0  ;;  %v3660_v28 = vadd.f32 %v825_v16, %v626_v36  ;;  %1904 = vmatprep.mubr.f32.mxu0 %v4298_v42  ;;  %2096 = vmatprep.mubr.f32.mxu1 %v4298_v42 }
 0x124   :  { %v635_v11 = vpop.f32.mrf.mxu0  ;;  %v827_v43 = vpop.f32.mrf.mxu1 }
 0x125   :  { %v636_v54 = vadd.f32 %v635_v11, %v3475_v23  ;;  %v3665_v3 = vadd.f32 %v827_v43, %v628_v59 }
 0x126   :  { %v641_v55 = vpop.f32.mrf.mxu0  ;;  %v834_v21 = vpop.f32.mrf.mxu1  ;;  %1907 = vmatmul.mubr.f32.gmra.mxu0 %v3378_v8  ;;  %2100 = vmatmul.mubr.f32.gmra.mxu1 %v4305_v52  ;;  %v4307_v8 = vand.u32 4294901760, %v3399_v29 }
 0x127   :  { %v642_v0 = vadd.f32 %v641_v55, %v3487_v44  ;;  %v3671_v37 = vadd.f32 %v834_v21, %v634_v13  ;;  %1912 = vmatprep.mubr.f32.mxu0 %v4298_v42  ;;  %2105 = vmatprep.mubr.f32.mxu1 %v4298_v42 }
 0x128   :  { %v643_v6 = vpop.f32.mrf.mxu0  ;;  %v836_v30 = vpop.f32.mrf.mxu1 }
 0x129   :  { %v644_v23 = vadd.f32 %v643_v6, %v3495_v56  ;;  %v3676_v60 = vadd.f32 %v836_v30, %v636_v54 }
 0x12a   :  { %v649_v36 = vpop.f32.mrf.mxu0  ;;  %v843_v31 = vpop.f32.mrf.mxu1  ;;  %1915 = vmatmul.mubr.f32.gmra.mxu0 %v3399_v29  ;;  %2109 = vmatmul.mubr.f32.gmra.mxu1 %v4306_v48  ;;  %v4308_v29 = vand.u32 4294901760, %v3423_v7 }
 0x12b   :  { %v650_v44 = vadd.f32 %v649_v36, %v3507_v51  ;;  %v3682_v50 = vadd.f32 %v843_v31, %v642_v0  ;;  %1920 = vmatprep.mubr.f32.mxu0 %v4298_v42  ;;  %2114 = vmatprep.mubr.f32.mxu1 %v4298_v42 }
 0x12c   :  { %v651_v59 = vpop.f32.mrf.mxu0  ;;  %v845_v53 = vpop.f32.mrf.mxu1 }
 0x12d   :  { %v652_v56 = vadd.f32 %v651_v59, %v3515_v17  ;;  %v3687_v16 = vadd.f32 %v845_v53, %v644_v23 }
 0x12e   :  { %v657_v19 = vpop.f32.mrf.mxu0  ;;  %v852_v13 = vpop.f32.mrf.mxu1  ;;  %1923 = vmatmul.mubr.f32.gmra.mxu0 %v3423_v7  ;;  %2118 = vmatmul.mubr.f32.gmra.mxu1 %v4307_v8  ;;  %v4309_v7 = vand.u32 4294901760, %v3443_v24 }
 0x12f   :  { %v658_v51 = vadd.f32 %v657_v19, %v3527_v22  ;;  %v3693_v11 = vadd.f32 %v852_v13, %v650_v44  ;;  %1928 = vmatprep.mubr.f32.mxu0 %v4298_v42  ;;  %2123 = vmatprep.mubr.f32.mxu1 %v4298_v42 }
 0x130   :  { %v659_v43 = vpop.f32.mrf.mxu0  ;;  %v854_v54 = vpop.f32.mrf.mxu1 }
 0x131   :  { %v660_v17 = vadd.f32 %v659_v43, %v3532_v46  ;;  %v3698_v55 = vadd.f32 %v854_v54, %v652_v56 }
 0x132   :  { %v665_v21 = vpop.f32.mrf.mxu0  ;;  %v861_v52 = vpop.f32.mrf.mxu1  ;;  %1931 = vmatmul.mubr.f32.gmra.mxu0 %v3443_v24  ;;  %2127 = vmatmul.mubr.f32.gmra.mxu1 %v4308_v29  ;;  %v4310_v24 = vand.u32 4294901760, %v3465_v63 }
 0x133   :  { %v666_v22 = vadd.f32 %v665_v21, %v3544_v9  ;;  %v3704_v0 = vadd.f32 %v861_v52, %v658_v51  ;;  %1936 = vmatprep.mubr.f32.mxu0 %v4298_v42  ;;  %2132 = vmatprep.mubr.f32.mxu1 %v4298_v42 }
 0x134   :  { %v667_v6 = vpop.f32.mrf.mxu0  ;;  %v863_v30 = vpop.f32.mrf.mxu1 }
 0x135   :  { %v668_v46 = vadd.f32 %v667_v6, %v3548_v14  ;;  %v3709_v23 = vadd.f32 %v863_v30, %v660_v17 }
 0x136   :  { %v673_v36 = vpop.f32.mrf.mxu0  ;;  %v870_v31 = vpop.f32.mrf.mxu1  ;;  %1939 = vmatmul.mubr.f32.gmra.mxu0 %v3465_v63  ;;  %2136 = vmatmul.mubr.f32.gmra.mxu1 %v4309_v7  ;;  %v4311_v63 = vand.u32 4294901760, %v3478_v35 }
 0x137   :  { %v674_v9 = vadd.f32 %v673_v36, %v3558_v58  ;;  %v3715_v48 = vadd.f32 %v870_v31, %v666_v22  ;;  %1944 = vmatprep.mubr.f32.mxu0 %v4298_v42  ;;  %2141 = vmatprep.mubr.f32.mxu1 %v4298_v42 }
 0x138   :  { %v675_v44 = vpop.f32.mrf.mxu0  ;;  %v872_v59 = vpop.f32.mrf.mxu1 }
 0x139   :  { %v676_v14 = vadd.f32 %v675_v44, %v3562_v39  ;;  %v3720_v53 = vadd.f32 %v872_v59, %v668_v46 }
 0x13a   :  { %v681_v56 = vpop.f32.mrf.mxu0  ;;  %v879_v19 = vpop.f32.mrf.mxu1  ;;  %1947 = vmatmul.mubr.f32.gmra.mxu0 %v3478_v35  ;;  %2145 = vmatmul.mubr.f32.gmra.mxu1 %v4310_v24  ;;  %v4312_v35 = vand.u32 4294901760, %v3503_v27 }
 0x13b   :  { %v682_v58 = vadd.f32 %v681_v56, %v3569_v61  ;;  %v3726_v13 = vadd.f32 %v879_v19, %v674_v9  ;;  %1952 = vmatprep.mubr.f32.mxu0 %v4298_v42  ;;  %2150 = vmatprep.mubr.f32.mxu1 %v4298_v42 }
 0x13c   :  { %v683_v8 = vpop.f32.mrf.mxu0  ;;  %v881_v51 = vpop.f32.mrf.mxu1 }
 0x13d   :  { %v684_v39 = vadd.f32 %v683_v8, %v3573_v33  ;;  %v3731_v43 = vadd.f32 %v881_v51, %v676_v14 }
 0x13e   :  { %v689_v54 = vpop.f32.mrf.mxu0  ;;  %v888_v17 = vpop.f32.mrf.mxu1  ;;  %1955 = vmatmul.mubr.f32.gmra.mxu0 %v3503_v27  ;;  %2154 = vmatmul.mubr.f32.gmra.mxu1 %v4311_v63  ;;  %v4313_v27 = vand.u32 4294901760, %v3523_v57 }
 0x13f   :  { %v690_v61 = vadd.f32 %v689_v54, %v3579_v10  ;;  %v3737_v21 = vadd.f32 %v888_v17, %v682_v58  ;;  %1960 = vmatprep.mubr.f32.mxu0 %v4298_v42  ;;  %2159 = vmatprep.mubr.f32.mxu1 %v4298_v42 }
 0x140   :  { %v691_v52 = vpop.f32.mrf.mxu0  ;;  %v890_v29 = vpop.f32.mrf.mxu1 }
 0x141   :  { %v692_v33 = vadd.f32 %v691_v52, %v3583_v34  ;;  %v3742_v22 = vadd.f32 %v890_v29, %v684_v39 }
 0x142   :  { %v697_v6 = vpop.f32.mrf.mxu0  ;;  %v897_v30 = vpop.f32.mrf.mxu1  ;;  %1963 = vmatmul.mubr.f32.gmra.mxu0 %v3523_v57  ;;  %2163 = vmatmul.mubr.f32.gmra.mxu1 %v4312_v35  ;;  %v4314_v57 = vand.u32 4294901760, %v3540_v5 }
 0x143   :  { %v698_v10 = vadd.f32 %v697_v6, %v3586_v32  ;;  %v3748_v46 = vadd.f32 %v897_v30, %v690_v61  ;;  %1968 = vmatprep.mubr.f32.mxu0 %v4298_v42  ;;  %2168 = vmatprep.mubr.f32.mxu1 %v4298_v42  ;;  %v4315_v61 = vand.u32 4294901760, %v3556_v41 }
 0x144   :  { %v699_v36 = vpop.f32.mrf.mxu0  ;;  %v899_v31 = vpop.f32.mrf.mxu1 }
 0x145   :  { %v700_v34 = vadd.f32 %v699_v36, %v3590_v18  ;;  %v3753_v7 = vadd.f32 %v899_v31, %v692_v33 }
 0x146   :  { %v705_v9 = vpop.f32.mrf.mxu0  ;;  %v906_v44 = vpop.f32.mrf.mxu1  ;;  %1971 = vmatmul.mubr.f32.gmra.mxu0 %v3540_v5  ;;  %2172 = vmatmul.mubr.f32.gmra.mxu1 %v4313_v27 }
 0x147   :  { %v706_v32 = vadd.f32 %v705_v9, %v3593_v4  ;;  %v3759_v59 = vadd.f32 %v906_v44, %v698_v10  ;;  %1976 = vmatprep.mubr.f32.mxu0 %v4298_v42  ;;  %2177 = vmatprep.mubr.f32.mxu1 %v4298_v42  ;;  %v4317_v44 = vld [vmem:[#allocation6_spill] sm:$0xff] }
 0x148   :  { %v707_v14 = vpop.f32.mrf.mxu0  ;;  %v908_v56 = vpop.f32.mrf.mxu1 }
 0x149   :  { %v708_v18 = vadd.f32 %v707_v14, %v3597_v15  ;;  %v3764_v19 = vadd.f32 %v908_v56, %v700_v34 }
 0x14a   :  { %v713_v24 = vpop.f32.mrf.mxu0  ;;  %v915_v58 = vpop.f32.mrf.mxu1  ;;  %1979 = vmatmul.mubr.f32.gmra.mxu0 %v3556_v41  ;;  %2181 = vmatmul.mubr.f32.gmra.mxu1 %v4314_v57  ;;  %v4316_v41 = vld [vmem:[#allocation5_spill] sm:$0xff] }
 0x14b   :  { %v714_v4 = vadd.f32 %v713_v24, %v3601_v26  ;;  %v3770_v8 = vadd.f32 %v915_v58, %v706_v32  ;;  %2186 = vmatprep.mubr.f32.mxu1 %v4298_v42  ;;  %2266 = vmatprep.mubr.f32.mxu0 %v4298_v42  ;;  %v4318_v24 = vld [vmem:[#allocation7_spill] sm:$0xff] }
 0x14c   :  { %v715_v51 = vpop.f32.mrf.mxu0  ;;  %v917_v39 = vpop.f32.mrf.mxu1 }
 0x14d   :  { %v716_v15 = vadd.f32 %v715_v51, %v3608_v2  ;;  %v3775_v54 = vadd.f32 %v917_v39, %v708_v18 }
 0x14e   :  { %v924_v17 = vpop.f32.mrf.mxu1  ;;  %v1002_v63 = vpop.f32.mrf.mxu0  ;;  %2190 = vmatmul.mubr.f32.gmra.mxu1 %v4315_v61  ;;  %2268 = vmatmul.mubr.f32.vlgmr.msra.gmra.mxu0 %v3267_v25 }
 0x14f   :  { %v3780_v5 = vadd.f32 %v924_v17, %v714_v4  ;;  %v1003_v26 = vadd.f32 %v1002_v63, %v3615_v12  ;;  %2273 = vmatprep.mubr.f32.mxu0 %v4298_v42  ;;  %2445 = vmatprep.mubr.f32.mxu1 %v4298_v42  ;;  %v4319_v17 = vld [vmem:[#allocation8_spill] sm:$0xff] }
 0x150   :  { %v926_v52 = vpop.f32.mrf.mxu1  ;;  %v1004_v29 = vpop.f32.mrf.mxu0 }
 0x151   :  { %v3785_v2 = vadd.f32 %v926_v52, %v716_v15  ;;  %v1005_v33 = vadd.f32 %v1004_v29, %v3621_v49 }
 0x152   :  { %v1009_v6 = vpop.f32.mrf.mxu0  ;;  %v1181_v30 = vpop.f32.mrf.mxu1  ;;  %2275 = vmatmul.mubr.f32.gmra.mxu0 %v4316_v41  ;;  %2447 = vmatmul.mubr.f32.vlgmr.msra.gmra.mxu1 %v3267_v25 }
 0x153   :  { %v1010_v35 = vadd.f32 %v1009_v6, %v3627_v20  ;;  %v3791_v10 = vadd.f32 %v1181_v30, %v1003_v26  ;;  %2280 = vmatprep.mubr.f32.mxu0 %v4298_v42  ;;  %2452 = vmatprep.mubr.f32.mxu1 %v4298_v42  ;;  %v4320_v6 = vld [vmem:[#allocation9_spill] sm:$0xff] }
 0x154   :  { %v1011_v12 = vpop.f32.mrf.mxu0  ;;  %v1183_v36 = vpop.f32.mrf.mxu1 }
 0x155   :  { %v1012_v31 = vadd.f32 %v1011_v12, %v3632_v38  ;;  %v3796_v34 = vadd.f32 %v1183_v36, %v1005_v33 }
 0x156   :  { %v1016_v49 = vpop.f32.mrf.mxu0  ;;  %v1188_v9 = vpop.f32.mrf.mxu1  ;;  %2282 = vmatmul.mubr.f32.gmra.mxu0 %v4317_v44  ;;  %2454 = vmatmul.mubr.f32.gmra.mxu1 %v4316_v41 }
 0x157   :  { %v1017_v25 = vadd.f32 %v1016_v49, %v3638_v40  ;;  %v3801_v20 = vadd.f32 %v1188_v9, %v1010_v35  ;;  %2287 = vmatprep.mubr.f32.mxu0 %v4298_v42  ;;  %2459 = vmatprep.mubr.f32.mxu1 %v4298_v42  ;;  %v4321_v49 = vld [vmem:[#allocation10_spill] sm:$0xff] }
 0x158   :  { %v1018_v27 = vpop.f32.mrf.mxu0  ;;  %v1190_v32 = vpop.f32.mrf.mxu1 }
 0x159   :  { %v1019_v38 = vadd.f32 %v1018_v27, %v3643_v47  ;;  %v3806_v14 = vadd.f32 %v1190_v32, %v1012_v31 }
 0x15a   :  { %v1023_v56 = vpop.f32.mrf.mxu0  ;;  %v1195_v18 = vpop.f32.mrf.mxu1  ;;  %2289 = vmatmul.mubr.f32.gmra.mxu0 %v4318_v24  ;;  %2461 = vmatmul.mubr.f32.gmra.mxu1 %v4317_v44 }
 0x15b   :  { %v1024_v40 = vadd.f32 %v1023_v56, %v3649_v62  ;;  %v3811_v58 = vadd.f32 %v1195_v18, %v1017_v25  ;;  %2294 = vmatprep.mubr.f32.mxu0 %v4298_v42  ;;  %2466 = vmatprep.mubr.f32.mxu1 %v4298_v42  ;;  %v4322_v56 = vld [vmem:[#allocation11_spill] sm:$0xff] }
 0x15c   :  { %v1025_v57 = vpop.f32.mrf.mxu0  ;;  %v1197_v4 = vpop.f32.mrf.mxu1 }
 0x15d   :  { %v1026_v47 = vadd.f32 %v1025_v57, %v3654_v1  ;;  %v3816_v51 = vadd.f32 %v1197_v4, %v1019_v38 }
 0x15e   :  { %v1030_v39 = vpop.f32.mrf.mxu0  ;;  %v1202_v15 = vpop.f32.mrf.mxu1  ;;  %2296 = vmatmul.mubr.f32.gmra.mxu0 %v4319_v17  ;;  %2468 = vmatmul.mubr.f32.gmra.mxu1 %v4318_v24 }
 0x15f   :  { %v1031_v62 = vadd.f32 %v1030_v39, %v3660_v28  ;;  %v3821_v63 = vadd.f32 %v1202_v15, %v1024_v40  ;;  %2301 = vmatprep.mubr.f32.mxu0 %v4298_v42  ;;  %2473 = vmatprep.mubr.f32.mxu1 %v4298_v42  ;;  %v4323_v39 = vld [vmem:[#allocation12_spill] sm:$0xff] }
 0x160   :  { %v1032_v61 = vpop.f32.mrf.mxu0  ;;  %v1204_v26 = vpop.f32.mrf.mxu1 }
 0x161   :  { %v1033_v1 = vadd.f32 %v1032_v61, %v3665_v3  ;;  %v3826_v52 = vadd.f32 %v1204_v26, %v1026_v47 }
 0x162   :  { %v1037_v29 = vpop.f32.mrf.mxu0  ;;  %v1209_v33 = vpop.f32.mrf.mxu1  ;;  %2303 = vmatmul.mubr.f32.gmra.mxu0 %v4320_v6  ;;  %2475 = vmatmul.mubr.f32.gmra.mxu1 %v4319_v17 }
 0x163   :  { %v1038_v28 = vadd.f32 %v1037_v29, %v3671_v37  ;;  %v3831_v30 = vadd.f32 %v1209_v33, %v1031_v62  ;;  %2308 = vmatprep.mubr.f32.mxu0 %v4298_v42  ;;  %2480 = vmatprep.mubr.f32.mxu1 %v4298_v42  ;;  %v4324_v29 = vld [vmem:[#allocation13_spill] sm:$0xff] }
 0x164   :  { %v1039_v41 = vpop.f32.mrf.mxu0  ;;  %v1211_v35 = vpop.f32.mrf.mxu1 }
 0x165   :  { %v1040_v3 = vadd.f32 %v1039_v41, %v3676_v60  ;;  %v3836_v12 = vadd.f32 %v1211_v35, %v1033_v1 }
 0x166   :  { %v1044_v36 = vpop.f32.mrf.mxu0  ;;  %v1216_v31 = vpop.f32.mrf.mxu1  ;;  %2310 = vmatmul.mubr.f32.gmra.mxu0 %v4321_v49  ;;  %2482 = vmatmul.mubr.f32.gmra.mxu1 %v4320_v6 }
 0x167   :  { %v1045_v37 = vadd.f32 %v1044_v36, %v3682_v50  ;;  %v3841_v9 = vadd.f32 %v1216_v31, %v1038_v28  ;;  %2315 = vmatprep.mubr.f32.mxu0 %v4298_v42  ;;  %2487 = vmatprep.mubr.f32.mxu1 %v4298_v42  ;;  %v4325_v36 = vld [vmem:[#allocation14_spill] sm:$0xff] }
 0x168   :  { %v1046_v44 = vpop.f32.mrf.mxu0  ;;  %v1218_v25 = vpop.f32.mrf.mxu1 }
 0x169   :  { %v1047_v60 = vadd.f32 %v1046_v44, %v3687_v16  ;;  %v3846_v27 = vadd.f32 %v1218_v25, %v1040_v3 }
 0x16a   :  { %v1051_v32 = vpop.f32.mrf.mxu0  ;;  %v1223_v38 = vpop.f32.mrf.mxu1  ;;  %2317 = vmatmul.mubr.f32.gmra.mxu0 %v4322_v56  ;;  %2489 = vmatmul.mubr.f32.gmra.mxu1 %v4321_v49 }
 0x16b   :  { %v1052_v50 = vadd.f32 %v1051_v32, %v3693_v11  ;;  %v3851_v18 = vadd.f32 %v1223_v38, %v1045_v37  ;;  %2322 = vmatprep.mubr.f32.mxu0 %v4298_v42  ;;  %2494 = vmatprep.mubr.f32.mxu1 %v4298_v42  ;;  %v4328_v32 = vld [vmem:[#allocation15_spill] sm:$0xff] }
 0x16c   :  { %v1053_v24 = vpop.f32.mrf.mxu0  ;;  %v1225_v40 = vpop.f32.mrf.mxu1 }
 0x16d   :  { %v1054_v16 = vadd.f32 %v1053_v24, %v3698_v55  ;;  %v3856_v57 = vadd.f32 %v1225_v40, %v1047_v60 }
 0x16e   :  { %v1058_v4 = vpop.f32.mrf.mxu0  ;;  %v1230_v47 = vpop.f32.mrf.mxu1  ;;  %2324 = vmatmul.mubr.f32.gmra.mxu0 %v4323_v39  ;;  %2496 = vmatmul.mubr.f32.gmra.mxu1 %v4322_v56 }
 0x16f   :  { %v1059_v11 = vadd.f32 %v1058_v4, %v3704_v0  ;;  %v3861_v15 = vadd.f32 %v1230_v47, %v1052_v50  ;;  %2329 = vmatprep.mubr.f32.mxu0 %v4298_v42  ;;  %2501 = vmatprep.mubr.f32.mxu1 %v4298_v42  ;;  %v4331_v4 = vld [vmem:[#allocation16_spill] sm:$0xff] }
 0x170   :  { %v1060_v17 = vpop.f32.mrf.mxu0  ;;  %v1232_v62 = vpop.f32.mrf.mxu1 }
 0x171   :  { %v1061_v55 = vadd.f32 %v1060_v17, %v3709_v23  ;;  %v3866_v61 = vadd.f32 %v1232_v62, %v1054_v16 }
 0x172   :  { %v1065_v26 = vpop.f32.mrf.mxu0  ;;  %v1237_v1 = vpop.f32.mrf.mxu1  ;;  %2331 = vmatmul.mubr.f32.gmra.mxu0 %v4324_v29  ;;  %2503 = vmatmul.mubr.f32.gmra.mxu1 %v4323_v39 }
 0x173   :  { %v1066_v0 = vadd.f32 %v1065_v26, %v3715_v48  ;;  %v3871_v33 = vadd.f32 %v1237_v1, %v1059_v11  ;;  %2336 = vmatprep.mubr.f32.mxu0 %v4298_v42  ;;  %2508 = vmatprep.mubr.f32.mxu1 %v4298_v42 }
 0x174   :  { %v1067_v6 = vpop.f32.mrf.mxu0  ;;  %v1239_v28 = vpop.f32.mrf.mxu1 }
 0x175   :  { %v1068_v23 = vadd.f32 %v1067_v6, %v3720_v53  ;;  %v3876_v41 = vadd.f32 %v1239_v28, %v1061_v55 }
 0x176   :  { %v1072_v35 = vpop.f32.mrf.mxu0  ;;  %v1244_v3 = vpop.f32.mrf.mxu1  ;;  %2338 = vmatmul.mubr.f32.gmra.mxu0 %v4325_v36  ;;  %2510 = vmatmul.mubr.f32.gmra.mxu1 %v4324_v29 }
 0x177   :  { %v1073_v48 = vadd.f32 %v1072_v35, %v3726_v13  ;;  %v3881_v31 = vadd.f32 %v1244_v3, %v1066_v0  ;;  %2343 = vmatprep.mubr.f32.mxu0 %v4298_v42  ;;  %2515 = vmatprep.mubr.f32.mxu1 %v4298_v42 }
 0x178   :  { %v1074_v49 = vpop.f32.mrf.mxu0  ;;  %v1246_v37 = vpop.f32.mrf.mxu1 }
 0x179   :  { %4326 = vst [vmem:[#allocation5_spill] sm:$0xff] %v3881_v31  ;;  %v1075_v53 = vadd.f32 %v1074_v49, %v3731_v43  ;;  %v3886_v44 = vadd.f32 %v1246_v37, %v1068_v23  ;;  %v4336_v23 = vld [vmem:[#allocation17_spill] sm:$0xff] }
 0x17a   :  { %v1079_v25 = vpop.f32.mrf.mxu0  ;;  %v1251_v60 = vpop.f32.mrf.mxu1  ;;  %2345 = vmatmul.mubr.f32.gmra.mxu0 %v4328_v32  ;;  %2517 = vmatmul.mubr.f32.gmra.mxu1 %v4325_v36 }
 0x17b   :  { %4327 = vst [vmem:[#allocation6_spill] sm:$0xff] %v3886_v44  ;;  %v1080_v13 = vadd.f32 %v1079_v25, %v3737_v21  ;;  %v3891_v38 = vadd.f32 %v1251_v60, %v1073_v48  ;;  %2350 = vmatprep.mubr.f32.mxu0 %v4298_v42  ;;  %2522 = vmatprep.mubr.f32.mxu1 %v4298_v42 }
 0x17c   :  { %v1081_v56 = vpop.f32.mrf.mxu0  ;;  %v1253_v50 = vpop.f32.mrf.mxu1 }
 0x17d   :  { %4329 = vst [vmem:[#allocation7_spill] sm:$0xff] %v3891_v38  ;;  %v1082_v43 = vadd.f32 %v1081_v56, %v3742_v22  ;;  %v3896_v24 = vadd.f32 %v1253_v50, %v1075_v53  ;;  %v4339_v53 = vld [vmem:[#allocation18_spill] sm:$0xff] }
 0x17e   :  { %v1086_v40 = vpop.f32.mrf.mxu0  ;;  %v1258_v16 = vpop.f32.mrf.mxu1  ;;  %2352 = vmatmul.mubr.f32.gmra.mxu0 %v4331_v4  ;;  %2524 = vmatmul.mubr.f32.gmra.mxu1 %v4328_v32 }
 0x17f   :  { %4330 = vst [vmem:[#allocation8_spill] sm:$0xff] %v3896_v24  ;;  %v1087_v21 = vadd.f32 %v1086_v40, %v3748_v46  ;;  %v3901_v47 = vadd.f32 %v1258_v16, %v1080_v13  ;;  %2357 = vmatprep.mubr.f32.mxu0 %v4298_v42  ;;  %2529 = vmatprep.mubr.f32.mxu1 %v4298_v42 }
 0x180   :  { %v1088_v39 = vpop.f32.mrf.mxu0  ;;  %v1260_v11 = vpop.f32.mrf.mxu1 }
 0x181   :  { %4332 = vst [vmem:[#allocation9_spill] sm:$0xff] %v3901_v47  ;;  %v1089_v22 = vadd.f32 %v1088_v39, %v3753_v7  ;;  %v3906_v17 = vadd.f32 %v1260_v11, %v1082_v43 }
 0x182   :  { %v1093_v62 = vpop.f32.mrf.mxu0  ;;  %v1265_v55 = vpop.f32.mrf.mxu1  ;;  %2359 = vmatmul.mubr.f32.gmra.mxu0 %v3505_v45  ;;  %2531 = vmatmul.mubr.f32.gmra.mxu1 %v4331_v4 }
 0x183   :  { %4333 = vst [vmem:[#allocation10_spill] sm:$0xff] %v3906_v17  ;;  %v1094_v46 = vadd.f32 %v1093_v62, %v3759_v59  ;;  %v3911_v26 = vadd.f32 %v1265_v55, %v1087_v21  ;;  %2364 = vmatprep.mubr.f32.mxu0 %v4298_v42  ;;  %2536 = vmatprep.mubr.f32.mxu1 %v4298_v42 }
 0x184   :  { %v1095_v1 = vpop.f32.mrf.mxu0  ;;  %v1267_v29 = vpop.f32.mrf.mxu1 }
 0x185   :  { %4334 = vst [vmem:[#allocation11_spill] sm:$0xff] %v3911_v26  ;;  %v1096_v7 = vadd.f32 %v1095_v1, %v3764_v19  ;;  %v3916_v0 = vadd.f32 %v1267_v29, %v1089_v22 }
 0x186   :  { %v1100_v6 = vpop.f32.mrf.mxu0  ;;  %v1272_v28 = vpop.f32.mrf.mxu1  ;;  %2366 = vmatmul.mubr.f32.gmra.mxu0 %v4336_v23  ;;  %2538 = vmatmul.mubr.f32.gmra.mxu1 %v3505_v45 }
 0x187   :  { %4335 = vst [vmem:[#allocation12_spill] sm:$0xff] %v3916_v0  ;;  %v1101_v59 = vadd.f32 %v1100_v6, %v3770_v8  ;;  %v3921_v35 = vadd.f32 %v1272_v28, %v1094_v46  ;;  %2371 = vmatprep.mubr.f32.mxu0 %v4298_v42  ;;  %2543 = vmatprep.mubr.f32.mxu1 %v4298_v42 }
 0x188   :  { %v1102_v3 = vpop.f32.mrf.mxu0  ;;  %v1274_v36 = vpop.f32.mrf.mxu1 }
 0x189   :  { %4337 = vst [vmem:[#allocation13_spill] sm:$0xff] %v3921_v35  ;;  %v1103_v19 = vadd.f32 %v1102_v3, %v3775_v54  ;;  %v3926_v48 = vadd.f32 %v1274_v36, %v1096_v7 }
 0x18a   :  { %v1107_v49 = vpop.f32.mrf.mxu0  ;;  %v1279_v37 = vpop.f32.mrf.mxu1  ;;  %2373 = vmatmul.mubr.f32.gmra.mxu0 %v4339_v53  ;;  %2545 = vmatmul.mubr.f32.gmra.mxu1 %v4336_v23 }
 0x18b   :  { %4338 = vst [vmem:[#allocation14_spill] sm:$0xff] %v3926_v48  ;;  %v1108_v45 = vadd.f32 %v1107_v49, %v3780_v5  ;;  %v3931_v8 = vadd.f32 %v1279_v37, %v1101_v59  ;;  %2550 = vmatprep.mubr.f32.mxu1 %v4298_v42 }
 0x18c   :  { %v1109_v25 = vpop.f32.mrf.mxu0  ;;  %v1281_v60 = vpop.f32.mrf.mxu1 }
 0x18d   :  { %4340 = vst [vmem:[#allocation15_spill] sm:$0xff] %v3931_v8  ;;  %v1110_v32 = vadd.f32 %v1109_v25, %v3785_v2  ;;  %v3935_v13 = vadd.f32 %v1281_v60, %v1103_v19 }
 0x18e   :  { %v1286_v54 = vpop.f32.mrf.mxu1  ;;  %v1431_v56 = vpop.f32.mrf.mxu0  ;;  %2552 = vmatmul.mubr.f32.gmra.mxu1 %v4339_v53 }
 0x18f   :  { %4341 = vst [vmem:[#allocation16_spill] sm:$0xff] %v3935_v13  ;;  %v3938_v50 = vadd.f32 %v1286_v54, %v1108_v45 }
 0x190   :  { %v1288_v43 = vpop.f32.mrf.mxu1  ;;  %v1433_v40 = vpop.f32.mrf.mxu0 }
 0x191   :  { %4342 = vst [vmem:[#allocation17_spill] sm:$0xff] %v3938_v50  ;;  %v3940_v16 = vadd.f32 %v1288_v43, %v1110_v32 }
 0x192   :  { %v1442_v5 = vpop.f32.mrf.mxu0  ;;  %v1678_v4 = vpop.f32.mrf.mxu1 }
 0x193   :  { %4343 = vst [vmem:[#allocation18_spill] sm:$0xff] %v3940_v16  ;;  %v3942_v21 = vadd.f32 %v1678_v4, %v1431_v56 }
 0x194   :  { %v1444_v42 = vpop.f32.mrf.mxu0  ;;  %v1680_v39 = vpop.f32.mrf.mxu1 }
 0x195   :  { %v3944_v11 = vadd.f32 %v1680_v39, %v1433_v40 }
 0x196   :  { %v1453_v2 = vpop.f32.mrf.mxu0  ;;  %v1685_v22 = vpop.f32.mrf.mxu1 }
 0x197   :  { %v3946_v62 = vadd.f32 %v1685_v22, %v1442_v5 }
 0x198   :  { %v1455_v55 = vpop.f32.mrf.mxu0  ;;  %v1687_v46 = vpop.f32.mrf.mxu1 }
 0x199   :  { %v3948_v1 = vadd.f32 %v1687_v46, %v1444_v42 }
 0x19a   :  { %v1464_v29 = vpop.f32.mrf.mxu0  ;;  %v1692_v7 = vpop.f32.mrf.mxu1 }
 0x19b   :  { %v3950_v6 = vadd.f32 %v1692_v7, %v1453_v2 }
 0x19c   :  { %v1466_v28 = vpop.f32.mrf.mxu0  ;;  %v1694_v23 = vpop.f32.mrf.mxu1 }
 0x19d   :  { %v3952_v59 = vadd.f32 %v1694_v23, %v1455_v55 }
 0x19e   :  { %v1475_v3 = vpop.f32.mrf.mxu0  ;;  %v1699_v36 = vpop.f32.mrf.mxu1 }
 0x19f   :  { %v3954_v19 = vadd.f32 %v1699_v36, %v1464_v29 }
 0x1a0   :  { %v1477_v49 = vpop.f32.mrf.mxu0  ;;  %v1701_v37 = vpop.f32.mrf.mxu1 }
 0x1a1   :  { %v3956_v53 = vadd.f32 %v1701_v37, %v1466_v28 }
 0x1a2   :  { %v1486_v45 = vpop.f32.mrf.mxu0  ;;  %v1706_v25 = vpop.f32.mrf.mxu1 }
 0x1a3   :  { %v3958_v60 = vadd.f32 %v1706_v25, %v1475_v3 }
 0x1a4   :  { %v1488_v32 = vpop.f32.mrf.mxu0  ;;  %v1708_v54 = vpop.f32.mrf.mxu1 }
 0x1a5   :  { %v3960_v56 = vadd.f32 %v1708_v54, %v1477_v49 }
 0x1a6   :  { %v1497_v43 = vpop.f32.mrf.mxu0  ;;  %v1713_v40 = vpop.f32.mrf.mxu1 }
 0x1a7   :  { %v3962_v5 = vadd.f32 %v1713_v40, %v1486_v45 }
 0x1a8   :  { %v1499_v4 = vpop.f32.mrf.mxu0  ;;  %v1715_v42 = vpop.f32.mrf.mxu1 }
 0x1a9   :  { %v3964_v39 = vadd.f32 %v1715_v42, %v1488_v32 }
 0x1aa   :  { %v1508_v2 = vpop.f32.mrf.mxu0  ;;  %v1720_v22 = vpop.f32.mrf.mxu1 }
 0x1ab   :  { %v3966_v55 = vadd.f32 %v1720_v22, %v1497_v43 }
 0x1ac   :  { %v1510_v46 = vpop.f32.mrf.mxu0  ;;  %v1722_v29 = vpop.f32.mrf.mxu1 }
 0x1ad   :  { %v3968_v7 = vadd.f32 %v1722_v29, %v1499_v4 }
 0x1ae   :  { %v1519_v28 = vpop.f32.mrf.mxu0  ;;  %v1727_v23 = vpop.f32.mrf.mxu1 }
 0x1af   :  { %v3970_v3 = vadd.f32 %v1727_v23, %v1508_v2 }
 0x1b0   :  { %v1521_v36 = vpop.f32.mrf.mxu0  ;;  %v1729_v49 = vpop.f32.mrf.mxu1 }
 0x1b1   :  { %v3972_v37 = vadd.f32 %v1729_v49, %v1510_v46 }
 0x1b2   :  { %v1530_v45 = vpop.f32.mrf.mxu0  ;;  %v1734_v25 = vpop.f32.mrf.mxu1 }
 0x1b3   :  { %v3974_v32 = vadd.f32 %v1734_v25, %v1519_v28 }
 0x1b4   :  { %v1532_v54 = vpop.f32.mrf.mxu0  ;;  %v1736_v40 = vpop.f32.mrf.mxu1 }
 0x1b5   :  { %v3976_v43 = vadd.f32 %v1736_v40, %v1521_v36 }
 0x1b6   :  { %v1541_v42 = vpop.f32.mrf.mxu0  ;;  %v1741_v22 = vpop.f32.mrf.mxu1 }
 0x1b7   :  { %v3978_v4 = vadd.f32 %v1741_v22, %v1530_v45 }
 0x1b8   :  { %v1543_v29 = vpop.f32.mrf.mxu0  ;;  %v1743_v16 = vpop.f32.mrf.mxu1 }
 0x1b9   :  { %v3980_v2 = vadd.f32 %v1743_v16, %v1532_v54 }
 0x1ba   :  { %v1552_v23 = vpop.f32.mrf.mxu0  ;;  %v1748_v50 = vpop.f32.mrf.mxu1 }
 0x1bb   :  { %v3982_v46 = vadd.f32 %v1748_v50, %v1541_v42 }
 0x1bc   :  { %v1554_v49 = vpop.f32.mrf.mxu0  ;;  %v1750_v13 = vpop.f32.mrf.mxu1 }
 0x1bd   :  { %v3984_v28 = vadd.f32 %v1750_v13, %v1543_v29 }
 0x1be   :  { %v1563_v25 = vpop.f32.mrf.mxu0  ;;  %v1755_v8 = vpop.f32.mrf.mxu1 }
 0x1bf   :  { %v3986_v36 = vadd.f32 %v1755_v8, %v1552_v23 }
 0x1c0   :  { %v1565_v40 = vpop.f32.mrf.mxu0  ;;  %v1757_v48 = vpop.f32.mrf.mxu1 }
 0x1c1   :  { %v3988_v45 = vadd.f32 %v1757_v48, %v1554_v49 }
 0x1c2   :  { %v1574_v22 = vpop.f32.mrf.mxu0  ;;  %v1762_v35 = vpop.f32.mrf.mxu1 }
 0x1c3   :  { %v3990_v16 = vadd.f32 %v1762_v35, %v1563_v25 }
 0x1c4   :  { %v1576_v54 = vpop.f32.mrf.mxu0  ;;  %v1764_v0 = vpop.f32.mrf.mxu1 }
 0x1c5   :  { %v3992_v50 = vadd.f32 %v1764_v0, %v1565_v40 }
 0x1c6   :  { %v1585_v42 = vpop.f32.mrf.mxu0  ;;  %v1769_v26 = vpop.f32.mrf.mxu1 }
 0x1c7   :  { %v3994_v13 = vadd.f32 %v1769_v26, %v1574_v22 }
 0x1c8   :  { %v1587_v29 = vpop.f32.mrf.mxu0  ;;  %v1771_v17 = vpop.f32.mrf.mxu1 }
 0x1c9   :  { %v3996_v8 = vadd.f32 %v1771_v17, %v1576_v54 }
 0x1ca   :  { %v1596_v23 = vpop.f32.mrf.mxu0  ;;  %v1776_v47 = vpop.f32.mrf.mxu1 }
 0x1cb   :  { %v3998_v48 = vadd.f32 %v1776_v47, %v1585_v42 }
 0x1cc   :  { %v1598_v49 = vpop.f32.mrf.mxu0  ;;  %v1778_v24 = vpop.f32.mrf.mxu1 }
 0x1cd   :  { %v4000_v35 = vadd.f32 %v1778_v24, %v1587_v29 }
 0x1ce   :  { %v1783_v25 = vpop.f32.mrf.mxu1  ;;  %v1860_v38 = vpop.f32.mrf.mxu0 }
 0x1cf   :  { %4344 = vst [vmem:[#allocation19_spill] sm:$0xff] %v4000_v35  ;;  %v4002_v0 = vadd.f32 %v1783_v25, %v1596_v23  ;;  %v1861_v40 = vadd.f32 %v1860_v38, %v3942_v21 }
 0x1d0   :  { %v1785_v26 = vpop.f32.mrf.mxu1  ;;  %v1862_v22 = vpop.f32.mrf.mxu0 }
 0x1d1   :  { %4345 = vst [vmem:[#allocation20_spill] sm:$0xff] %v4002_v0  ;;  %v4005_v44 = vadd.f32 %v1785_v26, %v1598_v49  ;;  %v1863_v17 = vadd.f32 %v1862_v22, %v3944_v11 }
 0x1d2   :  { %v1868_v54 = vpop.f32.mrf.mxu0  ;;  %v2056_v31 = vpop.f32.mrf.mxu1 }
 0x1d3   :  { %4346 = vst [vmem:[#allocation21_spill] sm:$0xff] %v4005_v44  ;;  %v1869_v47 = vadd.f32 %v1868_v54, %v3946_v62  ;;  %v4009_v42 = vadd.f32 %v2056_v31, %v1861_v40 }
 0x1d4   :  { %v1870_v24 = vpop.f32.mrf.mxu0  ;;  %v2058_v29 = vpop.f32.mrf.mxu1 }
 0x1d5   :  { %v1871_v35 = vadd.f32 %v1870_v24, %v3948_v1  ;;  %v4012_v23 = vadd.f32 %v2058_v29, %v1863_v17 }
 0x1d6   :  { %v1876_v25 = vpop.f32.mrf.mxu0  ;;  %v2065_v38 = vpop.f32.mrf.mxu1 }
 0x1d7   :  { %v1877_v21 = vadd.f32 %v1876_v25, %v3950_v6  ;;  %v4015_v49 = vadd.f32 %v2065_v38, %v1869_v47 }
 0x1d8   :  { %v1878_v26 = vpop.f32.mrf.mxu0  ;;  %v2067_v11 = vpop.f32.mrf.mxu1 }
 0x1d9   :  { %v1879_v22 = vadd.f32 %v1878_v26, %v3952_v59  ;;  %v4018_v44 = vadd.f32 %v2067_v11, %v1871_v35 }
 0x1da   :  { %v1884_v31 = vpop.f32.mrf.mxu0  ;;  %v2074_v62 = vpop.f32.mrf.mxu1 }
 0x1db   :  { %v1885_v40 = vadd.f32 %v1884_v31, %v3954_v19  ;;  %v4021_v54 = vadd.f32 %v2074_v62, %v1877_v21 }
 0x1dc   :  { %v1886_v1 = vpop.f32.mrf.mxu0  ;;  %v2076_v17 = vpop.f32.mrf.mxu1 }
 0x1dd   :  { %v1887_v24 = vadd.f32 %v1886_v1, %v3956_v53  ;;  %v4024_v29 = vadd.f32 %v2076_v17, %v1879_v22 }
 0x1de   :  { %v1892_v6 = vpop.f32.mrf.mxu0  ;;  %v2083_v47 = vpop.f32.mrf.mxu1 }
 0x1df   :  { %v1893_v25 = vadd.f32 %v1892_v6, %v3958_v60  ;;  %v4027_v38 = vadd.f32 %v2083_v47, %v1885_v40 }
 0x1e0   :  { %v1894_v59 = vpop.f32.mrf.mxu0  ;;  %v2085_v35 = vpop.f32.mrf.mxu1 }
 0x1e1   :  { %v1895_v26 = vadd.f32 %v1894_v59, %v3960_v56  ;;  %v4030_v11 = vadd.f32 %v2085_v35, %v1887_v24 }
 0x1e2   :  { %v1900_v19 = vpop.f32.mrf.mxu0  ;;  %v2092_v21 = vpop.f32.mrf.mxu1 }
 0x1e3   :  { %v1901_v31 = vadd.f32 %v1900_v19, %v3962_v5  ;;  %v4033_v62 = vadd.f32 %v2092_v21, %v1893_v25 }
 0x1e4   :  { %v1902_v53 = vpop.f32.mrf.mxu0  ;;  %v2094_v22 = vpop.f32.mrf.mxu1 }
 0x1e5   :  { %v1903_v1 = vadd.f32 %v1902_v53, %v3964_v39  ;;  %v4036_v17 = vadd.f32 %v2094_v22, %v1895_v26 }
 0x1e6   :  { %v1908_v60 = vpop.f32.mrf.mxu0  ;;  %v2101_v40 = vpop.f32.mrf.mxu1 }
 0x1e7   :  { %v1909_v6 = vadd.f32 %v1908_v60, %v3966_v55  ;;  %v4039_v47 = vadd.f32 %v2101_v40, %v1901_v31 }
 0x1e8   :  { %v1910_v56 = vpop.f32.mrf.mxu0  ;;  %v2103_v24 = vpop.f32.mrf.mxu1 }
 0x1e9   :  { %v1911_v59 = vadd.f32 %v1910_v56, %v3968_v7  ;;  %v4042_v35 = vadd.f32 %v2103_v24, %v1903_v1 }
 0x1ea   :  { %v1916_v5 = vpop.f32.mrf.mxu0  ;;  %v2110_v25 = vpop.f32.mrf.mxu1 }
 0x1eb   :  { %v1917_v19 = vadd.f32 %v1916_v5, %v3970_v3  ;;  %v4045_v21 = vadd.f32 %v2110_v25, %v1909_v6 }
 0x1ec   :  { %v1918_v39 = vpop.f32.mrf.mxu0  ;;  %v2112_v26 = vpop.f32.mrf.mxu1 }
 0x1ed   :  { %v1919_v53 = vadd.f32 %v1918_v39, %v3972_v37  ;;  %v4048_v22 = vadd.f32 %v2112_v26, %v1911_v59 }
 0x1ee   :  { %v1924_v55 = vpop.f32.mrf.mxu0  ;;  %v2119_v31 = vpop.f32.mrf.mxu1 }
 0x1ef   :  { %v1925_v60 = vadd.f32 %v1924_v55, %v3974_v32  ;;  %v4051_v40 = vadd.f32 %v2119_v31, %v1917_v19 }
 0x1f0   :  { %v1926_v7 = vpop.f32.mrf.mxu0  ;;  %v2121_v1 = vpop.f32.mrf.mxu1 }
 0x1f1   :  { %v1927_v56 = vadd.f32 %v1926_v7, %v3976_v43  ;;  %v4054_v24 = vadd.f32 %v2121_v1, %v1919_v53 }
 0x1f2   :  { %v1932_v3 = vpop.f32.mrf.mxu0  ;;  %v2128_v6 = vpop.f32.mrf.mxu1 }
 0x1f3   :  { %v1933_v5 = vadd.f32 %v1932_v3, %v3978_v4  ;;  %v4057_v25 = vadd.f32 %v2128_v6, %v1925_v60 }
 0x1f4   :  { %v1934_v37 = vpop.f32.mrf.mxu0  ;;  %v2130_v59 = vpop.f32.mrf.mxu1 }
 0x1f5   :  { %v1935_v39 = vadd.f32 %v1934_v37, %v3980_v2  ;;  %v4060_v26 = vadd.f32 %v2130_v59, %v1927_v56 }
 0x1f6   :  { %v1940_v32 = vpop.f32.mrf.mxu0  ;;  %v2137_v19 = vpop.f32.mrf.mxu1 }
 0x1f7   :  { %v1941_v55 = vadd.f32 %v1940_v32, %v3982_v46  ;;  %v4063_v31 = vadd.f32 %v2137_v19, %v1933_v5 }
 0x1f8   :  { %v1942_v43 = vpop.f32.mrf.mxu0  ;;  %v2139_v53 = vpop.f32.mrf.mxu1 }
 0x1f9   :  { %v1943_v7 = vadd.f32 %v1942_v43, %v3984_v28  ;;  %v4066_v1 = vadd.f32 %v2139_v53, %v1935_v39 }
 0x1fa   :  { %v1948_v4 = vpop.f32.mrf.mxu0  ;;  %v2146_v60 = vpop.f32.mrf.mxu1 }
 0x1fb   :  { %v1949_v3 = vadd.f32 %v1948_v4, %v3986_v36  ;;  %v4069_v6 = vadd.f32 %v2146_v60, %v1941_v55 }
 0x1fc   :  { %v1950_v2 = vpop.f32.mrf.mxu0  ;;  %v2148_v56 = vpop.f32.mrf.mxu1 }
 0x1fd   :  { %v1951_v37 = vadd.f32 %v1950_v2, %v3988_v45  ;;  %v4072_v59 = vadd.f32 %v2148_v56, %v1943_v7 }
 0x1fe   :  { %v1956_v46 = vpop.f32.mrf.mxu0  ;;  %v2155_v5 = vpop.f32.mrf.mxu1 }
 0x1ff   :  { %v1957_v32 = vadd.f32 %v1956_v46, %v3990_v16  ;;  %v4075_v19 = vadd.f32 %v2155_v5, %v1949_v3 }
 0x200   :  { %v1958_v28 = vpop.f32.mrf.mxu0  ;;  %v2157_v39 = vpop.f32.mrf.mxu1 }
 0x201   :  { %v1959_v43 = vadd.f32 %v1958_v28, %v3992_v50  ;;  %v4078_v53 = vadd.f32 %v2157_v39, %v1951_v37 }
 0x202   :  { %v1964_v36 = vpop.f32.mrf.mxu0  ;;  %v2164_v55 = vpop.f32.mrf.mxu1 }
 0x203   :  { %v1965_v4 = vadd.f32 %v1964_v36, %v3994_v13  ;;  %v4081_v60 = vadd.f32 %v2164_v55, %v1957_v32 }
 0x204   :  { %v1966_v45 = vpop.f32.mrf.mxu0  ;;  %v2166_v7 = vpop.f32.mrf.mxu1 }
 0x205   :  { %v1967_v2 = vadd.f32 %v1966_v45, %v3996_v8  ;;  %v4084_v56 = vadd.f32 %v2166_v7, %v1959_v43 }
 0x206   :  { %v1972_v16 = vpop.f32.mrf.mxu0  ;;  %v2173_v3 = vpop.f32.mrf.mxu1 }
 0x207   :  { %v1973_v46 = vadd.f32 %v1972_v16, %v3998_v48  ;;  %v4087_v5 = vadd.f32 %v2173_v3, %v1965_v4 }
 0x208   :  { %v4089_v50 = vpop.f32.mrf.mxu0  ;;  %v2175_v37 = vpop.f32.mrf.mxu1 }
 0x209   :  { %4347 = vst [vmem:[#allocation22_spill] sm:$0xff] %v4087_v5  ;;  %v4091_v28 = vadd.f32 %v2175_v37, %v1967_v2 }
 0x20a   :  { %v4093_v13 = vpop.f32.mrf.mxu0  ;;  %v2182_v32 = vpop.f32.mrf.mxu1 }
 0x20b   :  { %4348 = vst [vmem:[#allocation23_spill] sm:$0xff] %v4091_v28  ;;  %4349 = vst [vmem:[#allocation24_spill] sm:$0xff] %v4093_v13  ;;  %v4095_v39 = vadd.f32 %v2182_v32, %v1973_v46 }
 0x20c   :  { %v4097_v36 = vpop.f32.mrf.mxu0  ;;  %v4099_v8 = vpop.f32.mrf.mxu1 }
 0x20d   :  { %4350 = vst [vmem:[#allocation25_spill] sm:$0xff] %v4095_v39  ;;  %4351 = vst [vmem:[#allocation26_spill] sm:$0xff] %v4097_v36 }
 0x20e   :  { %4352 = vst [vmem:[#allocation27_spill] sm:$0xff] %v4099_v8  ;;  %v4101_v43 = vpop.f32.mrf.mxu1  ;;  %v2269_v55 = vpop.f32.mrf.mxu0 }
 0x20f   :  { %4353 = vst [vmem:[#allocation28_spill] sm:$0xff] %v4101_v43  ;;  %v2270_v45 = vadd.f32 %v2269_v55, %v4009_v42 }
 0x210   :  { %v4103_v48 = vpop.f32.mrf.mxu1  ;;  %v2271_v4 = vpop.f32.mrf.mxu0 }
 0x211   :  { %4354 = vst [vmem:[#allocation29_spill] sm:$0xff] %v4103_v48  ;;  %v2272_v16 = vadd.f32 %v2271_v4, %v4012_v23 }
 0x212   :  { %v2276_v7 = vpop.f32.mrf.mxu0  ;;  %v2448_v2 = vpop.f32.mrf.mxu1 }
 0x213   :  { %v2449_v3 = vadd.f32 %v2448_v2, %v2270_v45  ;;  %v2277_v32 = vadd.f32 %v2276_v7, %v4015_v49 }
 0x214   :  { %v2278_v37 = vpop.f32.mrf.mxu0  ;;  %v2450_v46 = vpop.f32.mrf.mxu1 }
 0x215   :  { %v2558_v36 = vmul.f32 %v2449_v3, %v3791_v10  ;;  %v2679_v39 = vmul.f32 %v2449_v3, %v3796_v34  ;;  %v2451_v43 = vadd.f32 %v2450_v46, %v2272_v16  ;;  %v2279_v13 = vadd.f32 %v2278_v37, %v4018_v44 }
 0x216   :  { %v2283_v28 = vpop.f32.mrf.mxu0  ;;  %v2455_v8 = vpop.f32.mrf.mxu1 }
 0x217   :  { %v2574_v48 = vmul.f32 %v2451_v43, %v3796_v34  ;;  %v2663_v42 = vmul.f32 %v2451_v43, %v3791_v10  ;;  %v2456_v55 = vadd.f32 %v2455_v8, %v2277_v32  ;;  %v2284_v23 = vadd.f32 %v2283_v28, %v4021_v54 }
 0x218   :  { %v2285_v4 = vpop.f32.mrf.mxu0  ;;  %v2457_v45 = vpop.f32.mrf.mxu1 }
 0x219   :  { %v2590_v2 = vsub.f32 %v2558_v36, %v2574_v48  ;;  %v2695_v49 = vadd.f32 %v2679_v39, %v2663_v42  ;;  %v2559_v7 = vmul.f32 %v2456_v55, %v3801_v20  ;;  %v2680_v3 = vmul.f32 %v2456_v55, %v3806_v14 }
 0x21a   :  { %v2458_v16 = vadd.f32 %v2457_v45, %v2279_v13  ;;  %v2290_v46 = vpop.f32.mrf.mxu0  ;;  %v2462_v0 = vpop.f32.mrf.mxu1  ;;  %v2286_v34 = vadd.f32 %v2285_v4, %v4024_v29 }
 0x21b   :  { %v2463_v5 = vadd.f32 %v2462_v0, %v2284_v23  ;;  %v2291_v28 = vadd.f32 %v2290_v46, %v4027_v38 }
 0x21c   :  { %v2575_v10 = vmul.f32 %v2458_v16, %v3806_v14  ;;  %v2664_v44 = vmul.f32 %v2458_v16, %v3801_v20  ;;  %v2292_v8 = vpop.f32.mrf.mxu0  ;;  %v2464_v54 = vpop.f32.mrf.mxu1 }
 0x21d   :  { %v2560_v39 = vmul.f32 %v2463_v5, %v3811_v58  ;;  %v2681_v36 = vmul.f32 %v2463_v5, %v3816_v51  ;;  %v2465_v43 = vadd.f32 %v2464_v54, %v2286_v34  ;;  %v2293_v55 = vadd.f32 %v2292_v8, %v4030_v11 }
 0x21e   :  { %v2591_v48 = vsub.f32 %v2559_v7, %v2575_v10  ;;  %v2696_v13 = vadd.f32 %v2680_v3, %v2664_v44  ;;  %v2297_v37 = vpop.f32.mrf.mxu0  ;;  %v2469_v32 = vpop.f32.mrf.mxu1 }
 0x21f   :  { %v2576_v29 = vmul.f32 %v2465_v43, %v3816_v51  ;;  %v2665_v0 = vmul.f32 %v2465_v43, %v3811_v58  ;;  %v2470_v14 = vadd.f32 %v2469_v32, %v2291_v28  ;;  %v2298_v38 = vadd.f32 %v2297_v37, %v4033_v62 }
 0x220   :  { %v2606_v42 = vadd.f32 %v2591_v48, %v2590_v2  ;;  %v2711_v20 = vadd.f32 %v2696_v13, %v2695_v49  ;;  %v2299_v23 = vpop.f32.mrf.mxu0  ;;  %v2471_v4 = vpop.f32.mrf.mxu1 }
 0x221   :  { %v2592_v45 = vsub.f32 %v2560_v39, %v2576_v29  ;;  %v2697_v5 = vadd.f32 %v2681_v36, %v2665_v0  ;;  %v2561_v7 = vmul.f32 %v2470_v14, %v3821_v63  ;;  %v2682_v3 = vmul.f32 %v2470_v14, %v3826_v52 }
 0x222   :  { %v2472_v16 = vadd.f32 %v2471_v4, %v2293_v55  ;;  %v2304_v46 = vpop.f32.mrf.mxu0  ;;  %v2476_v51 = vpop.f32.mrf.mxu1  ;;  %v2300_v2 = vadd.f32 %v2299_v23, %v4036_v17 }
 0x223   :  { %v2607_v34 = vadd.f32 %v2606_v42, %v2592_v45  ;;  %v2712_v58 = vadd.f32 %v2711_v20, %v2697_v5  ;;  %v2477_v49 = vadd.f32 %v2476_v51, %v2298_v38  ;;  %v2305_v8 = vadd.f32 %v2304_v46, %v4039_v47 }
 0x224   :  { %v2577_v11 = vmul.f32 %v2472_v16, %v3826_v52  ;;  %v2666_v62 = vmul.f32 %v2472_v16, %v3821_v63  ;;  %v2306_v10 = vpop.f32.mrf.mxu0  ;;  %v2478_v44 = vpop.f32.mrf.mxu1 }
 0x225   :  { %v2562_v54 = vmul.f32 %v2477_v49, %v3831_v30  ;;  %v2683_v28 = vmul.f32 %v2477_v49, %v3836_v12  ;;  %v2479_v39 = vadd.f32 %v2478_v44, %v2300_v2  ;;  %v2307_v29 = vadd.f32 %v2306_v10, %v4042_v35 }
 0x226   :  { %v2593_v36 = vsub.f32 %v2561_v7, %v2577_v11  ;;  %v2698_v43 = vadd.f32 %v2682_v3, %v2666_v62  ;;  %v2311_v48 = vpop.f32.mrf.mxu0  ;;  %v2483_v13 = vpop.f32.mrf.mxu1 }
 0x227   :  { %v2578_v17 = vmul.f32 %v2479_v39, %v3836_v12  ;;  %v2667_v37 = vmul.f32 %v2479_v39, %v3831_v30  ;;  %v2484_v52 = vadd.f32 %v2483_v13, %v2305_v8  ;;  %v2312_v47 = vadd.f32 %v2311_v48, %v4045_v21 }
 0x228   :  { %v2608_v32 = vadd.f32 %v2607_v34, %v2593_v36  ;;  %v2713_v63 = vadd.f32 %v2712_v58, %v2698_v43  ;;  %v2313_v0 = vpop.f32.mrf.mxu0  ;;  %v2485_v14 = vpop.f32.mrf.mxu1 }
 0x229   :  { %v2594_v42 = vsub.f32 %v2562_v54, %v2578_v17  ;;  %v2699_v20 = vadd.f32 %v2683_v28, %v2667_v37  ;;  %v2563_v55 = vmul.f32 %v2484_v52, %v3841_v9  ;;  %v2684_v38 = vmul.f32 %v2484_v52, %v3846_v27 }
 0x22a   :  { %v2486_v23 = vadd.f32 %v2485_v14, %v2307_v29  ;;  %v2318_v4 = vpop.f32.mrf.mxu0  ;;  %v2490_v12 = vpop.f32.mrf.mxu1  ;;  %v2314_v5 = vadd.f32 %v2313_v0, %v4048_v22 }
 0x22b   :  { %v2609_v45 = vadd.f32 %v2608_v32, %v2594_v42  ;;  %v2714_v30 = vadd.f32 %v2713_v63, %v2699_v20  ;;  %v2491_v7 = vadd.f32 %v2490_v12, %v2312_v47  ;;  %v2319_v46 = vadd.f32 %v2318_v4, %v4051_v40 }
 0x22c   :  { %v2579_v35 = vmul.f32 %v2486_v23, %v3846_v27  ;;  %v2668_v21 = vmul.f32 %v2486_v23, %v3841_v9  ;;  %v2320_v3 = vpop.f32.mrf.mxu0  ;;  %v2492_v16 = vpop.f32.mrf.mxu1 }
 0x22d   :  { %v2564_v51 = vmul.f32 %v2491_v7, %v3851_v18  ;;  %v2685_v34 = vmul.f32 %v2491_v7, %v3856_v57  ;;  %v2493_v58 = vadd.f32 %v2492_v16, %v2314_v5  ;;  %v2321_v8 = vadd.f32 %v2320_v3, %v4054_v24  ;;  %v4356_v16 = vld [vmem:[#allocation6_spill] sm:$0xff] }
 0x22e   :  { %v2595_v2 = vsub.f32 %v2563_v55, %v2579_v35  ;;  %v2700_v49 = vadd.f32 %v2684_v38, %v2668_v21  ;;  %v2325_v11 = vpop.f32.mrf.mxu0  ;;  %v2497_v62 = vpop.f32.mrf.mxu1  ;;  %v4355_v21 = vld [vmem:[#allocation5_spill] sm:$0xff] }
 0x22f   :  { %v2580_v22 = vmul.f32 %v2493_v58, %v3856_v57  ;;  %v2669_v10 = vmul.f32 %v2493_v58, %v3851_v18  ;;  %v2498_v27 = vadd.f32 %v2497_v62, %v2319_v46  ;;  %v2326_v40 = vadd.f32 %v2325_v11, %v4057_v25  ;;  %v4357_v62 = vld [vmem:[#allocation7_spill] sm:$0xff] }
 0x230   :  { %v2610_v44 = vadd.f32 %v2609_v45, %v2595_v2  ;;  %v2715_v9 = vadd.f32 %v2714_v30, %v2700_v49  ;;  %v2327_v54 = vpop.f32.mrf.mxu0  ;;  %v2499_v28 = vpop.f32.mrf.mxu1 }
 0x231   :  { %v2596_v39 = vsub.f32 %v2564_v51, %v2580_v22  ;;  %v2701_v36 = vadd.f32 %v2685_v34, %v2669_v10  ;;  %v2565_v43 = vmul.f32 %v2498_v27, %v3861_v15  ;;  %v2686_v48 = vmul.f32 %v2498_v27, %v3866_v61  ;;  %v4358_v10 = vld [vmem:[#allocation8_spill] sm:$0xff] }
 0x232   :  { %v2500_v13 = vadd.f32 %v2499_v28, %v2321_v8  ;;  %v2332_v17 = vpop.f32.mrf.mxu0  ;;  %v2504_v57 = vpop.f32.mrf.mxu1  ;;  %v2328_v52 = vadd.f32 %v2327_v54, %v4060_v26 }
 0x233   :  { %v2611_v37 = vadd.f32 %v2610_v44, %v2596_v39  ;;  %v2716_v18 = vadd.f32 %v2715_v9, %v2701_v36  ;;  %v2505_v32 = vadd.f32 %v2504_v57, %v2326_v40  ;;  %v2333_v47 = vadd.f32 %v2332_v17, %v4063_v31 }
 0x234   :  { %v2581_v24 = vmul.f32 %v2500_v13, %v3866_v61  ;;  %v2670_v25 = vmul.f32 %v2500_v13, %v3861_v15  ;;  %v2334_v63 = vpop.f32.mrf.mxu0  ;;  %v2506_v29 = vpop.f32.mrf.mxu1 }
 0x235   :  { %v2566_v0 = vmul.f32 %v2505_v32, %v3871_v33  ;;  %v2687_v14 = vmul.f32 %v2505_v32, %v3876_v41  ;;  %v2507_v42 = vadd.f32 %v2506_v29, %v2328_v52  ;;  %v2335_v31 = vadd.f32 %v2334_v63, %v4066_v1  ;;  %v4360_v32 = vld [vmem:[#allocation10_spill] sm:$0xff] }
 0x236   :  { %v2597_v20 = vsub.f32 %v2565_v43, %v2581_v24  ;;  %v2702_v55 = vadd.f32 %v2686_v48, %v2670_v25  ;;  %v2339_v38 = vpop.f32.mrf.mxu0  ;;  %v2511_v23 = vpop.f32.mrf.mxu1 }
 0x237   :  { %v2582_v26 = vmul.f32 %v2507_v42, %v3876_v41  ;;  %v2671_v4 = vmul.f32 %v2507_v42, %v3871_v33  ;;  %v2512_v61 = vadd.f32 %v2511_v23, %v2333_v47  ;;  %v2340_v45 = vadd.f32 %v2339_v38, %v4069_v6 }
 0x238   :  { %v4160_v12 = vadd.f32 %v2611_v37, %v2597_v20  ;;  %v4162_v15 = vadd.f32 %v2716_v18, %v2702_v55  ;;  %v2341_v30 = vpop.f32.mrf.mxu0  ;;  %v2513_v5 = vpop.f32.mrf.mxu1  ;;  %v4359_v18 = vld [vmem:[#allocation9_spill] sm:$0xff]  ;;  %v4361_v20 = vld [vmem:[#allocation19_spill] sm:$0xff] }
 0x239   :  { %v2598_v7 = vsub.f32 %v2566_v0, %v2582_v26  ;;  %v2703_v35 = vadd.f32 %v2687_v14, %v2671_v4  ;;  %v2567_v3 = vmul.f32 %v2512_v61, %v4355_v21  ;;  %v2688_v46 = vmul.f32 %v2512_v61, %v4356_v16  ;;  %v4362_v26 = vld [vmem:[#allocation22_spill] sm:$0xff]  ;;  %v4363_v61 = vld [vmem:[#allocation11_spill] sm:$0xff] }
 0x23a   :  { %v2514_v41 = vadd.f32 %v2513_v5, %v2335_v31  ;;  %v2346_v51 = vpop.f32.mrf.mxu0  ;;  %v2518_v33 = vpop.f32.mrf.mxu1  ;;  %v2342_v34 = vadd.f32 %v2341_v30, %v4072_v59 }
 0x23b   :  { %v2519_v58 = vadd.f32 %v2518_v33, %v2340_v45  ;;  %v2347_v11 = vadd.f32 %v2346_v51, %v4075_v19  ;;  %v4364_v45 = vld [vmem:[#allocation12_spill] sm:$0xff] }
 0x23c   :  { %v2583_v2 = vmul.f32 %v2514_v41, %v4356_v16  ;;  %v2672_v1 = vmul.f32 %v2514_v41, %v4355_v21  ;;  %v2348_v49 = vpop.f32.mrf.mxu0  ;;  %v2520_v6 = vpop.f32.mrf.mxu1 }
 0x23d   :  { %v2568_v22 = vmul.f32 %v2519_v58, %v4357_v62  ;;  %v2689_v27 = vmul.f32 %v2519_v58, %v4358_v10  ;;  %v2521_v44 = vadd.f32 %v2520_v6, %v2342_v34  ;;  %v2349_v48 = vadd.f32 %v2348_v49, %v4078_v53  ;;  %v4369_v6 = vld [vmem:[#allocation25_spill] sm:$0xff] }
 0x23e   :  { %v2599_v9 = vsub.f32 %v2567_v3, %v2583_v2  ;;  %v2704_v8 = vadd.f32 %v2688_v46, %v2672_v1  ;;  %v2353_v40 = vpop.f32.mrf.mxu0  ;;  %v2525_v54 = vpop.f32.mrf.mxu1  ;;  %v1975_v53 = vadd.f32 %v4089_v50, %v4361_v20  ;;  %v4367_v46 = vld [vmem:[#allocation27_spill] sm:$0xff] }
 0x23f   :  { %v2584_v59 = vmul.f32 %v2521_v44, %v4358_v10  ;;  %v2673_v28 = vmul.f32 %v2521_v44, %v4357_v62  ;;  %v2526_v39 = vadd.f32 %v2525_v54, %v2347_v11  ;;  %v2354_v19 = vadd.f32 %v2353_v40, %v4081_v60  ;;  %v4368_v1 = vld [vmem:[#allocation23_spill] sm:$0xff]  ;;  %v4370_v44 = vld [vmem:[#allocation13_spill] sm:$0xff]  ;;  %v4372_v54 = vld [vmem:[#allocation28_spill] sm:$0xff] }
 0x240   :  { %v2619_v36 = vadd.f32 %v2599_v9, %v2598_v7  ;;  %v2724_v43 = vadd.f32 %v2704_v8, %v2703_v35  ;;  %v2355_v13 = vpop.f32.mrf.mxu0  ;;  %v2527_v17 = vpop.f32.mrf.mxu1  ;;  %v4365_v7 = vld [vmem:[#allocation20_spill] sm:$0xff]  ;;  %v2185_v41 = vadd.f32 %v4367_v46, %v1975_v53  ;;  %v4371_v8 = vld [vmem:[#allocation14_spill] sm:$0xff] }
 0x241   :  { %v2600_v57 = vsub.f32 %v2568_v22, %v2584_v59  ;;  %v2705_v37 = vadd.f32 %v2689_v27, %v2673_v28  ;;  %v2569_v52 = vmul.f32 %v2526_v39, %v4359_v18  ;;  %v2690_v24 = vmul.f32 %v2526_v39, %v4360_v32  ;;  %v4366_v35 = vld [vmem:[#allocation24_spill] sm:$0xff] }
 0x242   :  { %v2528_v25 = vadd.f32 %v2527_v17, %v2349_v48  ;;  %v2360_v63 = vpop.f32.mrf.mxu0  ;;  %v2532_v29 = vpop.f32.mrf.mxu1  ;;  %v2356_v14 = vadd.f32 %v2355_v13, %v4084_v56  ;;  %v1981_v56 = vadd.f32 %v4366_v35, %v4365_v7  ;;  %v4373_v17 = vld [vmem:[#allocation21_spill] sm:$0xff] }
 0x243   :  { %v2620_v47 = vadd.f32 %v2619_v36, %v2600_v57  ;;  %v2725_v0 = vadd.f32 %v2724_v43, %v2705_v37  ;;  %v2533_v42 = vadd.f32 %v2532_v29, %v2354_v19  ;;  %v2361_v4 = vadd.f32 %v2360_v63, %v4362_v26  ;;  %v4374_v57 = vld [vmem:[#allocation26_spill] sm:$0xff]  ;;  %v4376_v29 = vld [vmem:[#allocation16_spill] sm:$0xff] }
 0x244   :  { %v2585_v60 = vmul.f32 %v2528_v25, %v4360_v32  ;;  %v2674_v55 = vmul.f32 %v2528_v25, %v4359_v18  ;;  %v2362_v38 = vpop.f32.mrf.mxu0  ;;  %v2534_v23 = vpop.f32.mrf.mxu1  ;;  %v2192_v59 = vadd.f32 %v4372_v54, %v1981_v56  ;;  %v1983_v37 = vadd.f32 %v4374_v57, %v4373_v17  ;;  %v4375_v25 = vld [vmem:[#allocation15_spill] sm:$0xff]  ;;  %v4378_v56 = vld [vmem:[#allocation17_spill] sm:$0xff] }
 0x245   :  { %v2570_v31 = vmul.f32 %v2533_v42, %v4363_v61  ;;  %v2691_v30 = vmul.f32 %v2533_v42, %v4364_v45  ;;  %v2535_v5 = vadd.f32 %v2534_v23, %v2356_v14  ;;  %v2363_v49 = vadd.f32 %v2362_v38, %v4368_v1  ;;  %v4377_v42 = vld [vmem:[#allocation29_spill] sm:$0xff] }
 0x246   :  { %v2601_v21 = vsub.f32 %v2569_v52, %v2585_v60  ;;  %v2706_v3 = vadd.f32 %v2690_v24, %v2674_v55  ;;  %v2367_v16 = vpop.f32.mrf.mxu0  ;;  %v2539_v50 = vpop.f32.mrf.mxu1  ;;  %v2194_v20 = vadd.f32 %v4377_v42, %v1983_v37  ;;  %v2613_v38 = vrot.slane %v4160_v12, 4 }
 0x247   :  { %v2586_v51 = vmul.f32 %v2535_v5, %v4364_v45  ;;  %v2675_v33 = vmul.f32 %v2535_v5, %v4363_v61  ;;  %v2540_v34 = vadd.f32 %v2539_v50, %v2361_v4  ;;  %v2368_v11 = vadd.f32 %v2367_v16, %v4369_v6 }
 0x248   :  { %v2621_v58 = vadd.f32 %v2620_v47, %v2601_v21  ;;  %v2726_v2 = vadd.f32 %v2725_v0, %v2706_v3  ;;  %v2369_v62 = vpop.f32.mrf.mxu0  ;;  %v2541_v22 = vpop.f32.mrf.mxu1  ;;  %v2718_v61 = vrot.slane %v4162_v15, 4  ;;  %v4379_v3 = vld [vmem:[#allocation18_spill] sm:$0xff] }
 0x249   :  { %v2602_v10 = vsub.f32 %v2570_v31, %v2586_v51  ;;  %v2707_v27 = vadd.f32 %v2691_v30, %v2675_v33  ;;  %v2571_v9 = vmul.f32 %v2540_v34, %v4370_v44  ;;  %v2692_v40 = vmul.f32 %v2540_v34, %v4371_v8 }
 0x24a   :  { %v2542_v28 = vadd.f32 %v2541_v22, %v2363_v49  ;;  %v2374_v39 = vpop.f32.mrf.mxu0  ;;  %v2546_v36 = vpop.f32.mrf.mxu1  ;;  %v2370_v19 = vadd.f32 %v2369_v62, %v2185_v41  ;;  %v2614_v51 = vadd.f32 %v2613_v38, %v4160_v12  ;;  %v2719_v33 = vadd.f32 %v2718_v61, %v4162_v15 }
 0x24b   :  { %v2622_v43 = vadd.f32 %v2621_v58, %v2602_v10  ;;  %v2727_v48 = vadd.f32 %v2726_v2, %v2707_v27  ;;  %v2547_v13 = vadd.f32 %v2546_v36, %v2368_v11  ;;  %v2375_v24 = vadd.f32 %v2374_v39, %v2192_v59 }
 0x24c   :  { %v2587_v18 = vmul.f32 %v2542_v28, %v4371_v8  ;;  %v2676_v52 = vmul.f32 %v2542_v28, %v4370_v44  ;;  %v2548_v32 = vpop.f32.mrf.mxu1  ;;  %v2376_v0 = vpop.f32.mrf.mxu0  ;;  %v2615_v49 = vrot.slane %v2614_v51, 2  ;;  %v2720_v6 = vrot.slane %v2719_v33, 2 }
 0x24d   :  { %v2572_v63 = vmul.f32 %v2547_v13, %v4375_v25  ;;  %v2693_v47 = vmul.f32 %v2547_v13, %v4376_v29  ;;  %v2549_v14 = vadd.f32 %v2548_v32, %v2370_v19  ;;  %v2377_v30 = vadd.f32 %v2376_v0, %v2194_v20 }
 0x24e   :  { %v2603_v53 = vsub.f32 %v2571_v9, %v2587_v18  ;;  %v2708_v60 = vadd.f32 %v2692_v40, %v2676_v52  ;;  %v2553_v55 = vpop.f32.mrf.mxu1  ;;  %v2803_v27 = vmov 1983009808   ;;  %v2637_v9 = vlaneseq }
 0x24f   :  { %v2588_v23 = vmul.f32 %v2549_v14, %v4376_v29  ;;  %v2677_v26 = vmul.f32 %v2549_v14, %v4375_v25  ;;  %v2554_v4 = vadd.f32 %v2553_v55, %v2375_v24  ;;  %v2635_v44 = vunpack.c.l.s4 %v2803_v27 }
 0x250   :  { %v2623_v31 = vadd.f32 %v2622_v43, %v2603_v53  ;;  %v2728_v45 = vadd.f32 %v2727_v48, %v2708_v60  ;;  %v2555_v5 = vpop.f32.mrf.mxu1  ;;  %v2616_v8 = vadd.f32 %v2615_v49, %v2614_v51  ;;  %v2721_v40 = vadd.f32 %v2720_v6, %v2719_v33 }
 0x251   :  { %v2604_v7 = vsub.f32 %v2572_v63, %v2588_v23  ;;  %v2709_v35 = vadd.f32 %v2693_v47, %v2677_v26  ;;  %v2573_v21 = vmul.f32 %v2554_v4, %v4378_v56  ;;  %v2694_v16 = vmul.f32 %v2554_v4, %v4379_v3 }
 0x252   :  { %v2556_v50 = vadd.f32 %v2555_v5, %v2377_v30  ;;  %v2636_v28 = vunpack.c.0.s8 %v2635_v44  ;;  %v2638_v39 = vshrl.u32 %v2637_v9, 7  ;;  %v2617_v36 = vrot.slane %v2616_v8, 1 }
 0x253   :  { %v2624_v46 = vadd.f32 %v2623_v31, %v2604_v7  ;;  %v2729_v41 = vadd.f32 %v2728_v45, %v2709_v35  ;;  %v2722_v43 = vrot.slane %v2721_v40, 1 }
 0x254   :  { %v2589_v34 = vmul.f32 %v2556_v50, %v4379_v3  ;;  %v2678_v58 = vmul.f32 %v2556_v50, %v4378_v56  ;;  %v2639_v57 = vsub.s32 %v2636_v28, %v2638_v39  ;;  %v2618_v37 = vadd.f32 %v2617_v36, %v2616_v8 }
 0x255   :  { %v2723_v18 = vadd.f32 %v2722_v43, %v2721_v40 }
 0x256   :  { %v2605_v2 = vsub.f32 %v2573_v21, %v2589_v34  ;;  %v2710_v1 = vadd.f32 %v2694_v16, %v2678_v58  ;;  %v2640_v63 = vrot.slane %v2618_v37, %v2639_v57 }
 0x257   :  { %v2745_v29 = vrot.slane %v2723_v18, %v2639_v57 }
 0x258   :  { %v2625_v11 = vadd.f32 %v2624_v46, %v2605_v2  ;;  %v2730_v62 = vadd.f32 %v2729_v41, %v2710_v1 }
 0x25a   :  { %v2626_v22 = vrot.slane %v2625_v11, 4  ;;  %v2731_v10 = vrot.slane %v2730_v62, 4 }
 0x25c   :  { %v2627_v12 = vadd.f32 %v2626_v22, %v2625_v11  ;;  %v2732_v54 = vadd.f32 %v2731_v10, %v2730_v62 }
 0x25e   :  { %v2628_v15 = vrot.slane %v2627_v12, 2  ;;  %v2733_v59 = vrot.slane %v2732_v54, 2 }
 0x260   :  { %v2629_v48 = vadd.f32 %v2628_v15, %v2627_v12  ;;  %v2734_v19 = vadd.f32 %v2733_v59, %v2732_v54 }
 0x262   :  { %v2630_v13 = vrot.slane %v2629_v48, 1  ;;  %v2735_v17 = vrot.slane %v2734_v19, 1 }
 0x264   :  { %v2631_v52 = vadd.f32 %v2630_v13, %v2629_v48  ;;  %v2736_v32 = vadd.f32 %v2735_v17, %v2734_v19 }
 0x266   :  { %v2647_v24 = vrot.slane %v2631_v52, %v2639_v57  ;;  %v2752_v25 = vrot.slane %v2736_v32, %v2639_v57 }
 0x268   :  { %v2652_v47 = vrot.slane %v2647_v24, 7  ;;  %v2755_v0 = vrot.slane %v2752_v25, 7 }
 0x26a   :  { %v2654_v14 = vsel %vm2653_vm3, %v2652_v47, %v2640_v63  ;;  %v2756_v42 = vsel %vm2653_vm3, %v2755_v0, %v2745_v29 }
 0x26b   :  { %v2656_v20 = vsel %vm2655_vm4, %v2652_v47, %v2654_v14  ;;  %v2757_v53 = vsel %vm2655_vm4, %v2755_v0, %v2756_v42 }
 0x26c   :  { %v2658_v60 = vsel %vm2657_vm5, %v2652_v47, %v2656_v20  ;;  %v2758_v55 = vsel %vm2657_vm5, %v2755_v0, %v2757_v53 }
 0x26d   :  { %v2660_v38 = vsel %vm2659_vm6, %v2652_v47, %v2658_v60  ;;  %v2759_v23 = vsel %vm2659_vm6, %v2755_v0, %v2758_v55 }
 0x26e   :  { %2662 = vst [vmem:[#allocation2] sm:$0x3] %v2660_v38  ;;  %2761 = vst [vmem:[#allocation2 + $0x2] sm:$0x3] %v2759_v23 }
 0x26f   :  { %2791 = shalt.err (!%p2788_p4)
}
 0x270   :  { %2771 = dma.vmem_to_hbm [thread:$0]  %s2769_s26, 64, %s4222_s4, [#allocation3]  }
 0x271   :  { %2800 = dma.done.wait [#allocation3], 64  }
 0x272   :  { %2801 = vsyncadd [#allocation3], 4294967232 }
 0x273   :  { %2775 = vsyncpa [#allocation3], 1 }

</bundles_post_ra>
